<compile_context>
chip_gen: v7x
topology: tpu7x:2x2x1
jax: 0.10.0
libtpu: 0.0.40
codegen_flags: <defaults>
</compile_context>

<pallas_src>
import jax
import jax.numpy as jnp
import numpy as np
from jax.experimental import pallas as pl
from jax.experimental.pallas import tpu as pltpu


IN_FEATURES = 28 * 28     # 784
HIDDEN = 512
NUM_CLASSES = 10

K1_PAD = 896              # 784 padded up to a multiple of 128 lanes (zero-padded)
N3_PAD = 128              # 10 padded up to a full lane width (zero-padded)
MAX_TILE_M = 128          # max batch-row tile


def _round_up(x, m):
    return (x + m - 1) // m * m


# ----------------------------------------------------------------------------
# Fused MLP kernel: one TILE_M row-block of the batch goes through all 3 layers.
# ----------------------------------------------------------------------------
def _fused_mlp_kernel(x_ref, w1_ref, b1_ref, w2_ref, b2_ref, w3_ref, b3_ref, o_ref):
    # x_ref : (TILE_M, K1_PAD)   bf16
    # w1    : (K1_PAD, HIDDEN)   bf16     b1: (1, HIDDEN)  f32
    # w2    : (HIDDEN, HIDDEN)   bf16     b2: (1, HIDDEN)  f32
    # w3    : (HIDDEN, N3_PAD)   bf16     b3: (1, N3_PAD)  f32
    # o_ref : (TILE_M, N3_PAD)   f32   (real logits are columns [:NUM_CLASSES])
    h1 = jnp.dot(x_ref[...], w1_ref[...], preferred_element_type=jnp.float32)
    h1 = jnp.maximum(h1 + b1_ref[...], 0.0)

    h2 = jnp.dot(h1.astype(jnp.bfloat16), w2_ref[...],
                 preferred_element_type=jnp.float32)
    h2 = jnp.maximum(h2 + b2_ref[...], 0.0)

    o_ref[...] = (
        jnp.dot(h2.astype(jnp.bfloat16), w3_ref[...],
                preferred_element_type=jnp.float32)
        + b3_ref[...]
    )


# ----------------------------------------------------------------------------
# Forward wrapper
# ----------------------------------------------------------------------------
@jax.jit
def fashion_mnist_forward(prepped, x):
    b = x.shape[0]                                        # static under jit
    xf = x.reshape(b, -1).astype(jnp.float32)             # nn.Flatten
    assert xf.shape[1] == IN_FEATURES

    # Adaptive batch tile: >=16 rows (bf16 sublane packing), <=128 rows.
    tile_m = min(MAX_TILE_M, _round_up(b, 16))
    m_pad = _round_up(b, tile_m)

    xp = jnp.pad(xf, ((0, m_pad - b), (0, K1_PAD - IN_FEATURES))).astype(jnp.bfloat16)

    grid = (m_pad // tile_m,)

    def _full(shape):
        # Weights/biases: same block every step -> stay resident in VMEM.
        return pl.BlockSpec(shape, lambda i: (0, 0))

    out = pl.pallas_call(
        _fused_mlp_kernel,
        out_shape=jax.ShapeDtypeStruct((m_pad, N3_PAD), jnp.float32),
        grid=grid,
        in_specs=[
            pl.BlockSpec((tile_m, K1_PAD), lambda i: (i, 0)),   # activations: tiled over M
            _full((K1_PAD, HIDDEN)),                            # w1
            _full((1, HIDDEN)),                                 # b1
            _full((HIDDEN, HIDDEN)),                            # w2
            _full((1, HIDDEN)),                                 # b2
            _full((HIDDEN, N3_PAD)),                            # w3 (Cout padded to 128)
            _full((1, N3_PAD)),                                 # b3
        ],
        out_specs=pl.BlockSpec((tile_m, N3_PAD), lambda i: (i, 0)),
        compiler_params=pltpu.CompilerParams(
            dimension_semantics=("parallel",),
            vmem_limit_bytes=32 * 1024 * 1024,
        ),
    )(xp, prepped["w1"], prepped["b1"], prepped["w2"], prepped["b2"],
      prepped["w3"], prepped["b3"])

    return out[:b, :NUM_CLASSES]


# ----------------------------------------------------------------------------
# Parameters (PyTorch nn.Linear layout: W (out, in), b (out,)) + one-time prep.
# ----------------------------------------------------------------------------
def init_params(key):
    def linear(k, fan_in, fan_out):
        k1, k2 = jax.random.split(k)
        bound = 1.0 / np.sqrt(fan_in)
        w = jax.random.uniform(k1, (fan_out, fan_in), jnp.float32, -bound, bound)
        b = jax.random.uniform(k2, (fan_out,), jnp.float32, -bound, bound)
        return w, b

    k1, k2, k3 = jax.random.split(key, 3)
    p = {}
    p["w1"], p["b1"] = linear(k1, IN_FEATURES, HIDDEN)
    p["w2"], p["b2"] = linear(k2, HIDDEN, HIDDEN)
    p["w3"], p["b3"] = linear(k3, HIDDEN, NUM_CLASSES)
    return p


def prepare_params(p):
    # Hoisted out of the forward path: transpose to (in, out), zero-pad to
    # lane-aligned shapes, cast weights to bf16 (biases stay f32).
    w1 = jnp.pad(p["w1"].T, ((0, K1_PAD - IN_FEATURES), (0, 0))).astype(jnp.bfloat16)
    w2 = p["w2"].T.astype(jnp.bfloat16)
    w3 = jnp.pad(p["w3"].T, ((0, 0), (0, N3_PAD - NUM_CLASSES))).astype(jnp.bfloat16)
    b1 = p["b1"].reshape(1, HIDDEN).astype(jnp.float32)
    b2 = p["b2"].reshape(1, HIDDEN).astype(jnp.float32)
    b3 = jnp.pad(p["b3"], (0, N3_PAD - NUM_CLASSES)).reshape(1, N3_PAD).astype(jnp.float32)
    return {"w1": w1, "b1": b1, "w2": w2, "b2": b2, "w3": w3, "b3": b3}


def reference_forward(p, x):
    # Pure-JAX f32 reference matching the PyTorch module semantics.
    xf = x.reshape(x.shape[0], -1).astype(jnp.float32)
    h = jnp.maximum(xf @ p["w1"].T + p["b1"], 0.0)
    h = jnp.maximum(h @ p["w2"].T + p["b2"], 0.0)
    return h @ p["w3"].T + p["b3"]


# ----------------------------------------------------------------------------
if __name__ == "__main__":
    key = jax.random.PRNGKey(0)
    pkey, xkey = jax.random.split(key)

    params = init_params(pkey)
    prepped = prepare_params(params)

    # FashionMNIST-style input: (N, C, H, W) = (2, 1, 28, 28).
    x = jax.random.normal(xkey, (2, 1, 28, 28), jnp.float32)

    logits = fashion_mnist_forward(prepped, x)
    logits = jax.block_until_ready(logits)

    assert logits.shape == (2, NUM_CLASSES)
    assert bool(jnp.all(jnp.isfinite(logits)))

    # Numerical check vs. f32 reference (loose tolerance: bf16 MXU inputs).
    ref = reference_forward(params, x)
    max_err = float(jnp.max(jnp.abs(logits - ref)))
    assert max_err < 0.2, f"max abs err vs reference: {max_err}"

    print("KERNEL_OK")
</pallas_src>

<mosaic_0001>
module attributes {stable_mosaic.version = 11 : i64} {
  func.func @_fused_mlp_kernel(%arg0: i32, %arg1: memref<16x896xbf16, #tpu.memory_space<vmem>>, %arg2: memref<896x512xbf16, #tpu.memory_space<vmem>>, %arg3: memref<1x512xf32, #tpu.memory_space<vmem>>, %arg4: memref<512x512xbf16, #tpu.memory_space<vmem>>, %arg5: memref<1x512xf32, #tpu.memory_space<vmem>>, %arg6: memref<512x128xbf16, #tpu.memory_space<vmem>>, %arg7: memref<1x128xf32, #tpu.memory_space<vmem>>, %arg8: memref<16x128xf32, #tpu.memory_space<vmem>>) attributes {dimension_semantics = [#tpu.dimension_semantics<parallel>], iteration_bounds = array<i64: 1>, scalar_prefetch = 0 : i64, scratch_operands = 0 : i64, tpu.core_type = #tpu.core_type<tc>, window_params = [{transform_indices = @transform_0, window_bounds = array<i64: 16, 896>}, {pipeline_mode = #tpu.pipeline_mode<synchronous>, transform_indices = @transform_1, window_bounds = array<i64: 896, 512>}, {pipeline_mode = #tpu.pipeline_mode<synchronous>, transform_indices = @transform_2, window_bounds = array<i64: 1, 512>}, {pipeline_mode = #tpu.pipeline_mode<synchronous>, transform_indices = @transform_3, window_bounds = array<i64: 512, 512>}, {pipeline_mode = #tpu.pipeline_mode<synchronous>, transform_indices = @transform_4, window_bounds = array<i64: 1, 512>}, {pipeline_mode = #tpu.pipeline_mode<synchronous>, transform_indices = @transform_5, window_bounds = array<i64: 512, 128>}, {pipeline_mode = #tpu.pipeline_mode<synchronous>, transform_indices = @transform_6, window_bounds = array<i64: 1, 128>}, {transform_indices = @transform_7, window_bounds = array<i64: 16, 128>}]} {
    %c0 = arith.constant 0 : index
    %c0_0 = arith.constant 0 : index
    %0 = vector.load %arg1[%c0, %c0_0] : memref<16x896xbf16, #tpu.memory_space<vmem>>, vector<16x896xbf16>
    %c0_1 = arith.constant 0 : index
    %c0_2 = arith.constant 0 : index
    %1 = vector.load %arg2[%c0_1, %c0_2] : memref<896x512xbf16, #tpu.memory_space<vmem>>, vector<896x512xbf16>
    %cst = arith.constant dense<0.000000e+00> : vector<16x512xf32>
    %2 = tpu.matmul %0, %1, %cst {dimension_numbers = #tpu.dot_dimension_numbers<[1], [0], [0], [1], [0, 0, 1, 1], [], []>} : vector<16x896xbf16>, vector<896x512xbf16>, vector<16x512xf32> -> vector<16x512xf32>
    %c0_3 = arith.constant 0 : index
    %c0_4 = arith.constant 0 : index
    %3 = vector.load %arg3[%c0_3, %c0_4] : memref<1x512xf32, #tpu.memory_space<vmem>>, vector<1x512xf32>
    %4 = vector.broadcast %3 : vector<1x512xf32> to vector<16x512xf32>
    %5 = arith.addf %2, %4 : vector<16x512xf32>
    %cst_5 = arith.constant 0.000000e+00 : f32
    %6 = vector.broadcast %cst_5 : f32 to vector<16x512xf32>
    %7 = arith.maximumf %5, %6 : vector<16x512xf32>
    %8 = arith.truncf %7 : vector<16x512xf32> to vector<16x512xbf16>
    %c0_6 = arith.constant 0 : index
    %c0_7 = arith.constant 0 : index
    %9 = vector.load %arg4[%c0_6, %c0_7] : memref<512x512xbf16, #tpu.memory_space<vmem>>, vector<512x512xbf16>
    %cst_8 = arith.constant dense<0.000000e+00> : vector<16x512xf32>
    %10 = tpu.matmul %8, %9, %cst_8 {dimension_numbers = #tpu.dot_dimension_numbers<[1], [0], [0], [1], [0, 0, 1, 1], [], []>} : vector<16x512xbf16>, vector<512x512xbf16>, vector<16x512xf32> -> vector<16x512xf32>
    %c0_9 = arith.constant 0 : index
    %c0_10 = arith.constant 0 : index
    %11 = vector.load %arg5[%c0_9, %c0_10] : memref<1x512xf32, #tpu.memory_space<vmem>>, vector<1x512xf32>
    %12 = vector.broadcast %11 : vector<1x512xf32> to vector<16x512xf32>
    %13 = arith.addf %10, %12 : vector<16x512xf32>
    %cst_11 = arith.constant 0.000000e+00 : f32
    %14 = vector.broadcast %cst_11 : f32 to vector<16x512xf32>
    %15 = arith.maximumf %13, %14 : vector<16x512xf32>
    %16 = arith.truncf %15 : vector<16x512xf32> to vector<16x512xbf16>
    %c0_12 = arith.constant 0 : index
    %c0_13 = arith.constant 0 : index
    %17 = vector.load %arg6[%c0_12, %c0_13] : memref<512x128xbf16, #tpu.memory_space<vmem>>, vector<512x128xbf16>
    %cst_14 = arith.constant dense<0.000000e+00> : vector<16x128xf32>
    %18 = tpu.matmul %16, %17, %cst_14 {dimension_numbers = #tpu.dot_dimension_numbers<[1], [0], [0], [1], [0, 0, 1, 1], [], []>} : vector<16x512xbf16>, vector<512x128xbf16>, vector<16x128xf32> -> vector<16x128xf32>
    %c0_15 = arith.constant 0 : index
    %c0_16 = arith.constant 0 : index
    %19 = vector.load %arg7[%c0_15, %c0_16] : memref<1x128xf32, #tpu.memory_space<vmem>>, vector<1x128xf32>
    %20 = vector.broadcast %19 : vector<1x128xf32> to vector<16x128xf32>
    %21 = arith.addf %18, %20 : vector<16x128xf32>
    %c0_17 = arith.constant 0 : index
    %c0_18 = arith.constant 0 : index
    %22 = vector.load %arg8[%c0_17, %c0_18] : memref<16x128xf32, #tpu.memory_space<vmem>>, vector<16x128xf32>
    tpu.vector_store %arg8[%c0_17, %c0_18], %21 {strides = array<i32>} : memref<16x128xf32, #tpu.memory_space<vmem>>, vector<16x128xf32>,
    return
  }
  func.func @transform_0(%arg0: i32) -> (i32, i32) {
    %c0_i32 = arith.constant 0 : i32
    %c0_i32_0 = arith.constant 0 : i32
    return %arg0, %c0_i32 : i32, i32
  }
  func.func @transform_1(%arg0: i32) -> (i32, i32) {
    %c0_i32 = arith.constant 0 : i32
    %c0_i32_0 = arith.constant 0 : i32
    %c0_i32_1 = arith.constant 0 : i32
    return %c0_i32, %c0_i32_0 : i32, i32
  }
  func.func @transform_2(%arg0: i32) -> (i32, i32) {
    %c0_i32 = arith.constant 0 : i32
    %c0_i32_0 = arith.constant 0 : i32
    %c0_i32_1 = arith.constant 0 : i32
    return %c0_i32, %c0_i32_0 : i32, i32
  }
  func.func @transform_3(%arg0: i32) -> (i32, i32) {
    %c0_i32 = arith.constant 0 : i32
    %c0_i32_0 = arith.constant 0 : i32
    %c0_i32_1 = arith.constant 0 : i32
    return %c0_i32, %c0_i32_0 : i32, i32
  }
  func.func @transform_4(%arg0: i32) -> (i32, i32) {
    %c0_i32 = arith.constant 0 : i32
    %c0_i32_0 = arith.constant 0 : i32
    %c0_i32_1 = arith.constant 0 : i32
    return %c0_i32, %c0_i32_0 : i32, i32
  }
  func.func @transform_5(%arg0: i32) -> (i32, i32) {
    %c0_i32 = arith.constant 0 : i32
    %c0_i32_0 = arith.constant 0 : i32
    %c0_i32_1 = arith.constant 0 : i32
    return %c0_i32, %c0_i32_0 : i32, i32
  }
  func.func @transform_6(%arg0: i32) -> (i32, i32) {
    %c0_i32 = arith.constant 0 : i32
    %c0_i32_0 = arith.constant 0 : i32
    %c0_i32_1 = arith.constant 0 : i32
    return %c0_i32, %c0_i32_0 : i32, i32
  }
  func.func @transform_7(%arg0: i32) -> (i32, i32) {
    %c0_i32 = arith.constant 0 : i32
    %c0_i32_0 = arith.constant 0 : i32
    return %arg0, %c0_i32 : i32, i32
  }
}

</mosaic_0001>

<bundles_post_ra>
// kernel: fashion_mnist_forward.1
= control target key start
LH: loop header
LB: loop body
LE: loop exit
PB: predicated region body
PF: predicated region fallthrough
CT: control target
= control target key end

     0   :  { %12 = vsyncpa [#allocation3], 0  ;;  %s4446_s0 = inlined_call_operand.vmem [shape: bf16[16,896], index: 0, kind: input, shape index: {}]   ;;  %s4447_s1 = inlined_call_operand.hbm [shape: bf16[896,512], index: 1, kind: input, shape index: {}]   ;;  %s4448_s2 = inlined_call_operand.vmem [shape: f32[1,512], index: 2, kind: input, shape index: {}]   ;;  %s4449_s3 = inlined_call_operand.hbm [shape: bf16[512,512], index: 3, kind: input, shape index: {}]   ;;  %s4450_s4 = inlined_call_operand.vmem [shape: f32[1,512], index: 4, kind: input, shape index: {}]   ;;  %s4451_s5 = inlined_call_operand.hbm [shape: bf16[512,128], index: 5, kind: input, shape index: {}]   ;;  %s4452_s6 = inlined_call_operand.vmem [shape: f32[1,128], index: 6, kind: input, shape index: {}]   ;;  %s4453_s7 = inlined_call_operand.vmem [shape: f32[16,128], index: 7, kind: output, shape index: {}]  }
   0x1   :  { %13 = vsyncpa [#allocation5], 0  ;;  %s4293_s24 = smov [#allocation4]   ;;  %s4294_s26 = smov [#allocation2]  }
   0x2   :  { %s35_s25 = sshll.u32 %s4293_s24, 4  ;;  %s21_s27 = sshll.u32 %s4294_s26, 4  ;;  %s36_s25 = int_to_ptr.vmem [resolvable:$true] %s35_s25  ;;  %s4341_s27 = int_to_ptr.vmem [resolvable:$true] %s21_s27 }
   0x3   :  { %s4223_s30 = scalar_lea.hbm %s4449_s3, 16384 }
   0x4   :  { %p4224_p0 = scmp.ne.s32.totalorder %s4449_s3, %s4223_s30  ;;  %p4227_p1 = scmp.lt.u32.totalorder %s4223_s30, %s4449_s3 }
   0x6   :  { %p4229_p2 = pnand %p4227_p1, %p4224_p0 }
   0x8   :  { %4232 = shalt.err (!%p4229_p2)
}
   0x9   :  { %s4233_s12 = scalar_lea.vmem %s36_s25, 16384  ;;  %p4238_p4 = scmp.lt.s32.totalorder %s36_s25, %s36_s25 }
   0xa   :  { %p4234_p3 = scmp.ne.s32.totalorder %s36_s25, %s4233_s12  ;;  %p4239_p5 = scmp.lt.s32.totalorder %s4233_s12, %s4233_s12 }
   0xc   :  { %p4240_p6 = por %p4239_p5, %p4238_p4 }
   0xe   :  { %p4241_p7 = pnand %p4240_p6, %p4234_p3 }
  0x10   :  { %4244 = shalt.err (!%p4241_p7)
}
  0x11   :  { %s4295_s13 = smov 256   ;;  %s4296_s14 = smov 16  }
  0x12   :  { %41 = dma.hbm_to_vmem [thread:$0]  %s4449_s3, 16384, %s36_s25, [#allocation5], %s4295_s13, %s4295_s13, %s4296_s14  }
  0x13   :  { %s4245_s19 = scalar_lea.hbm %s4447_s1, 28672 }
  0x14   :  { %p4246_p8 = scmp.ne.s32.totalorder %s4447_s1, %s4245_s19  ;;  %p4249_p9 = scmp.lt.u32.totalorder %s4245_s19, %s4447_s1 }
  0x16   :  { %p4251_p10 = pnand %p4249_p9, %p4246_p8 }
  0x18   :  { %4254 = shalt.err (!%p4251_p10)
}
  0x19   :  { %s4255_s24 = scalar_lea.vmem %s4341_s27, 28672  ;;  %p4260_p12 = scmp.lt.s32.totalorder %s4341_s27, %s4341_s27 }
  0x1a   :  { %p4256_p11 = scmp.ne.s32.totalorder %s4341_s27, %s4255_s24  ;;  %p4261_p13 = scmp.lt.s32.totalorder %s4255_s24, %s4255_s24 }
  0x1c   :  { %p4262_p0 = por %p4261_p13, %p4260_p12 }
  0x1e   :  { %p4263_p1 = pnand %p4262_p0, %p4256_p11 }
  0x20   :  { %4266 = shalt.err (!%p4263_p1)
}
  0x21   :  { %27 = dma.hbm_to_vmem [thread:$0]  %s4447_s1, 28672, %s4341_s27, [#allocation3], %s4295_s13, %s4295_s13, %s4296_s14  }
  0x22   :  { %s4297_s26 = smov [#allocation6]   ;;  %s4267_s8 = scalar_lea.hbm %s4451_s5, 4096 }
  0x23   :  { %s49_s28 = sshll.u32 %s4297_s26, 4  ;;  %p4268_p2 = scmp.ne.s32.totalorder %s4451_s5, %s4267_s8  ;;  %s50_s28 = int_to_ptr.vmem [resolvable:$true] %s49_s28 }
  0x24   :  { %p4271_p3 = scmp.lt.u32.totalorder %s4267_s8, %s4451_s5 }
  0x26   :  { %p4273_p4 = pnand %p4271_p3, %p4268_p2 }
  0x28   :  { %4276 = shalt.err (!%p4273_p4)
}
  0x29   :  { %s4277_s15 = scalar_lea.vmem %s50_s28, 4096  ;;  %p4282_p6 = scmp.lt.s32.totalorder %s50_s28, %s50_s28 }
  0x2a   :  { %p4278_p5 = scmp.ne.s32.totalorder %s50_s28, %s4277_s15  ;;  %p4283_p7 = scmp.lt.s32.totalorder %s4277_s15, %s4277_s15 }
  0x2c   :  { %p4284_p8 = por %p4283_p7, %p4282_p6 }
  0x2e   :  { %p4285_p9 = pnand %p4284_p8, %p4278_p5 }
  0x30   :  { %4288 = shalt.err (!%p4285_p9)
}
  0x31   :  { %s4298_s1 = smov 64   ;;  %s4299_s27 = smov 4  }
  0x32   :  { %55 = dma.hbm_to_vmem [thread:$0]  %s4451_s5, 4096, %s50_s28, [#allocation5], %s4298_s1, %s4298_s1, %s4299_s27  }
  0x33   :  { %4289 = dma.done.wait [#allocation3], 28672  }
  0x34   :  { %4290 = vsyncadd [#allocation3], 4294938624 }
  0x35   :  { %4291 = dma.done.wait [#allocation5], 20480  }
  0x36   :  { %4292 = vsyncadd [#allocation5], 4294946816  ;;  %v3653_v0 = vld [vmem:[#allocation2 + $0x4] ss:$16 sps:$4 sm:$0xff]   ;;  %v3655_v1 = vld [vmem:[#allocation2 + $0xc] ss:$16 sps:$4 sm:$0xff]  }
  0x37   :  { %1478 = vmatprep.subr.bf16.mxu0 %v3653_v0  ;;  %v3657_v2 = vld [vmem:[#allocation2] ss:$16 sps:$4 sm:$0xff]   ;;  %v3658_v3 = vld [vmem:[#allocation2 + $0x8] ss:$16 sps:$4 sm:$0xff]   ;;  %1650 = vmatprep.subr.bf16.mxu1 %v3655_v1  ;;  %v3659_v4 = vld [vmem:[#allocation2 + $0x24] ss:$16 sps:$4 sm:$0xff]  }
  0x38   :  { %1479 = vmatpush1.bf16.msra.mxu0 %v3657_v2  ;;  %1651 = vmatpush1.bf16.msra.mxu1 %v3658_v3  ;;  %v3661_v5 = vld [vmem:[#allocation2 + $0x2c] ss:$16 sps:$4 sm:$0xff]   ;;  %v3663_v6 = vld [vmem:[#allocation2 + $0x20] ss:$16 sps:$4 sm:$0xff]   ;;  %v3664_v7 = vld [vmem:[#allocation2 + $0x28] ss:$16 sps:$4 sm:$0xff]  }
  0x39   :  { %1480 = vmatprep.subr.bf16.mxu0 %v3659_v4  ;;  %1652 = vmatprep.subr.bf16.mxu1 %v3661_v5  ;;  %v3665_v8 = vld [vmem:[#allocation2 + $0x44] ss:$16 sps:$4 sm:$0xff]   ;;  %v3667_v9 = vld [vmem:[#allocation2 + $0x4c] ss:$16 sps:$4 sm:$0xff]   ;;  %v3669_v10 = vld [vmem:[#allocation2 + $0x40] ss:$16 sps:$4 sm:$0xff]  }
  0x3a   :  { %v3670_v11 = vld [vmem:[#allocation2 + $0x48] ss:$16 sps:$4 sm:$0xff]   ;;  %v3671_v12 = vld [vmem:[#allocation2 + $0x64] ss:$16 sps:$4 sm:$0xff]   ;;  %v3673_v13 = vld [vmem:[#allocation2 + $0x6c] ss:$16 sps:$4 sm:$0xff]  }
  0x3b   :  { %v3675_v14 = vld [vmem:[#allocation2 + $0x60] ss:$16 sps:$4 sm:$0xff]   ;;  %v3676_v15 = vld [vmem:[#allocation2 + $0x68] ss:$16 sps:$4 sm:$0xff]   ;;  %v3677_v16 = vld [vmem:[#allocation2 + $0x84] ss:$16 sps:$4 sm:$0xff]  }
  0x3c   :  { %1481 = vmatpush1.bf16.msra.mxu0 %v3663_v6  ;;  %1653 = vmatpush1.bf16.msra.mxu1 %v3664_v7  ;;  %v3679_v17 = vld [vmem:[#allocation2 + $0x8c] ss:$16 sps:$4 sm:$0xff]   ;;  %v3681_v18 = vld [vmem:[#allocation2 + $0x80] ss:$16 sps:$4 sm:$0xff]   ;;  %v3682_v19 = vld [vmem:[#allocation2 + $0x88] ss:$16 sps:$4 sm:$0xff]  }
  0x3d   :  { %1482 = vmatprep.subr.bf16.mxu0 %v3665_v8  ;;  %1654 = vmatprep.subr.bf16.mxu1 %v3667_v9  ;;  %v3683_v20 = vld [vmem:[#allocation2 + $0xa4] ss:$16 sps:$4 sm:$0xff]   ;;  %v3685_v21 = vld [vmem:[#allocation2 + $0xac] ss:$16 sps:$4 sm:$0xff]   ;;  %v3687_v22 = vld [vmem:[#allocation2 + $0xa0] ss:$16 sps:$4 sm:$0xff]  }
  0x3e   :  { %v3688_v23 = vld [vmem:[#allocation2 + $0xa8] ss:$16 sps:$4 sm:$0xff]   ;;  %v3689_v24 = vld [vmem:[#allocation2 + $0xc4] ss:$16 sps:$4 sm:$0xff]   ;;  %v3691_v25 = vld [vmem:[#allocation2 + $0xcc] ss:$16 sps:$4 sm:$0xff]  }
  0x3f   :  { %v3693_v26 = vld [vmem:[#allocation2 + $0xc0] ss:$16 sps:$4 sm:$0xff]   ;;  %v3694_v27 = vld [vmem:[#allocation2 + $0xc8] ss:$16 sps:$4 sm:$0xff]   ;;  %v3695_v28 = vld [vmem:[#allocation2 + $0xe4] ss:$16 sps:$4 sm:$0xff]  }
  0x40   :  { %1483 = vmatpush1.bf16.msra.mxu0 %v3669_v10  ;;  %1655 = vmatpush1.bf16.msra.mxu1 %v3670_v11  ;;  %v3697_v29 = vld [vmem:[#allocation2 + $0xec] ss:$16 sps:$4 sm:$0xff]   ;;  %v3699_v30 = vld [vmem:[#allocation2 + $0xe0] ss:$16 sps:$4 sm:$0xff]   ;;  %v3700_v31 = vld [vmem:[#allocation2 + $0xe8] ss:$16 sps:$4 sm:$0xff]  }
  0x41   :  { %1484 = vmatprep.subr.bf16.mxu0 %v3671_v12  ;;  %1656 = vmatprep.subr.bf16.mxu1 %v3673_v13  ;;  %v3701_v32 = vld [vmem:[#allocation2 + $0x104] ss:$16 sps:$4 sm:$0xff]   ;;  %v3703_v33 = vld [vmem:[#allocation2 + $0x10c] ss:$16 sps:$4 sm:$0xff]   ;;  %v3705_v34 = vld [vmem:[#allocation2 + $0x100] ss:$16 sps:$4 sm:$0xff]  }
  0x42   :  { %v3706_v35 = vld [vmem:[#allocation2 + $0x108] ss:$16 sps:$4 sm:$0xff]   ;;  %v3707_v36 = vld [vmem:[#allocation2 + $0x124] ss:$16 sps:$4 sm:$0xff]   ;;  %v3709_v37 = vld [vmem:[#allocation2 + $0x12c] ss:$16 sps:$4 sm:$0xff]  }
  0x43   :  { %v3711_v38 = vld [vmem:[#allocation2 + $0x120] ss:$16 sps:$4 sm:$0xff]   ;;  %v3712_v39 = vld [vmem:[#allocation2 + $0x128] ss:$16 sps:$4 sm:$0xff]   ;;  %v3713_v40 = vld [vmem:[#allocation2 + $0x144] ss:$16 sps:$4 sm:$0xff]  }
  0x44   :  { %1485 = vmatpush1.bf16.msra.mxu0 %v3675_v14  ;;  %1657 = vmatpush1.bf16.msra.mxu1 %v3676_v15  ;;  %v3715_v41 = vld [vmem:[#allocation2 + $0x14c] ss:$16 sps:$4 sm:$0xff]   ;;  %v3717_v42 = vld [vmem:[#allocation2 + $0x140] ss:$16 sps:$4 sm:$0xff]   ;;  %v3718_v43 = vld [vmem:[#allocation2 + $0x148] ss:$16 sps:$4 sm:$0xff]  }
  0x45   :  { %1486 = vmatprep.subr.bf16.mxu0 %v3677_v16  ;;  %1658 = vmatprep.subr.bf16.mxu1 %v3679_v17  ;;  %v3719_v44 = vld [vmem:[#allocation2 + $0x164] ss:$16 sps:$4 sm:$0xff]   ;;  %v3721_v45 = vld [vmem:[#allocation2 + $0x16c] ss:$16 sps:$4 sm:$0xff]   ;;  %v3723_v46 = vld [vmem:[#allocation2 + $0x160] ss:$16 sps:$4 sm:$0xff]  }
  0x46   :  { %v3724_v47 = vld [vmem:[#allocation2 + $0x168] ss:$16 sps:$4 sm:$0xff]   ;;  %v3751_v48 = vld [vmem:[%s4446_s0 + $0x4] ss:$28 sps:$4 sm:$0xff]   ;;  %v3727_v50 = vld [vmem:[#allocation2 + $0x18c] ss:$16 sps:$4 sm:$0xff]  }
  0x47   :  { %v3725_v49 = vld [vmem:[#allocation2 + $0x184] ss:$16 sps:$4 sm:$0xff]   ;;  %1510 = vmatprep.mubr.bf16.mxu0 %v3751_v48  ;;  %1682 = vmatprep.mubr.bf16.mxu1 %v3751_v48  ;;  %v3729_v51 = vld [vmem:[#allocation2 + $0x180] ss:$16 sps:$4 sm:$0xff]   ;;  %v3730_v52 = vld [vmem:[#allocation2 + $0x188] ss:$16 sps:$4 sm:$0xff]  }
  0x48   :  { %1487 = vmatpush1.bf16.msra.mxu0 %v3681_v18  ;;  %1659 = vmatpush1.bf16.msra.mxu1 %v3682_v19  ;;  %v3731_v53 = vld [vmem:[#allocation2 + $0x1a4] ss:$16 sps:$4 sm:$0xff]   ;;  %v3733_v54 = vld [vmem:[#allocation2 + $0x1ac] ss:$16 sps:$4 sm:$0xff]   ;;  %v3735_v55 = vld [vmem:[#allocation2 + $0x1a0] ss:$16 sps:$4 sm:$0xff]  }
  0x49   :  { %1488 = vmatprep.subr.bf16.mxu0 %v3683_v20  ;;  %1660 = vmatprep.subr.bf16.mxu1 %v3685_v21  ;;  %v3736_v56 = vld [vmem:[#allocation2 + $0x1a8] ss:$16 sps:$4 sm:$0xff]   ;;  %v3737_v57 = vld [vmem:[#allocation2 + $0x1c4] ss:$16 sps:$4 sm:$0xff]   ;;  %v3739_v58 = vld [vmem:[#allocation2 + $0x1cc] ss:$16 sps:$4 sm:$0xff]  }
  0x4a   :  { %v3741_v59 = vld [vmem:[#allocation2 + $0x1c0] ss:$16 sps:$4 sm:$0xff]   ;;  %v3742_v60 = vld [vmem:[#allocation2 + $0x1c8] ss:$16 sps:$4 sm:$0xff]   ;;  %v3743_v61 = vld [vmem:[#allocation2 + $0x1e4] ss:$16 sps:$4 sm:$0xff]  }
  0x4b   :  { %v3745_v62 = vld [vmem:[#allocation2 + $0x1ec] ss:$16 sps:$4 sm:$0xff]   ;;  %v3747_v63 = vld [vmem:[#allocation2 + $0x1e0] ss:$16 sps:$4 sm:$0xff]   ;;  %v3748_v0 = vld [vmem:[#allocation2 + $0x1e8] ss:$16 sps:$4 sm:$0xff]  }
  0x4c   :  { %1489 = vmatpush1.bf16.msra.mxu0 %v3687_v22  ;;  %1661 = vmatpush1.bf16.msra.mxu1 %v3688_v23  ;;  %v3754_v1 = vld [vmem:[#allocation2 + $0x204] ss:$16 sps:$4 sm:$0xff]   ;;  %v3757_v2 = vld [vmem:[#allocation2 + $0x20c] ss:$16 sps:$4 sm:$0xff]   ;;  %v3752_v4 = vld [vmem:[#allocation2 + $0x200] ss:$16 sps:$4 sm:$0xff]  }
  0x4d   :  { %1490 = vmatprep.subr.bf16.mxu0 %v3689_v24  ;;  %1662 = vmatprep.subr.bf16.mxu1 %v3691_v25  ;;  %v3749_v3 = vld [vmem:[%s4446_s0] ss:$28 sps:$4 sm:$0xff]   ;;  %v3755_v5 = vld [vmem:[#allocation2 + $0x208] ss:$16 sps:$4 sm:$0xff]   ;;  %v3760_v6 = vld [vmem:[#allocation2 + $0x224] ss:$16 sps:$4 sm:$0xff]  }
  0x4e   :  { %v3763_v7 = vld [vmem:[#allocation2 + $0x22c] ss:$16 sps:$4 sm:$0xff]   ;;  %v3758_v8 = vld [vmem:[#allocation2 + $0x220] ss:$16 sps:$4 sm:$0xff]   ;;  %v3761_v9 = vld [vmem:[#allocation2 + $0x228] ss:$16 sps:$4 sm:$0xff]  }
  0x4f   :  { %v3766_v10 = vld [vmem:[#allocation2 + $0x244] ss:$16 sps:$4 sm:$0xff]   ;;  %v3769_v11 = vld [vmem:[#allocation2 + $0x24c] ss:$16 sps:$4 sm:$0xff]   ;;  %v3764_v12 = vld [vmem:[#allocation2 + $0x240] ss:$16 sps:$4 sm:$0xff]  }
  0x50   :  { %1491 = vmatpush1.bf16.msra.mxu0 %v3693_v26  ;;  %1663 = vmatpush1.bf16.msra.mxu1 %v3694_v27  ;;  %v3767_v13 = vld [vmem:[#allocation2 + $0x248] ss:$16 sps:$4 sm:$0xff]   ;;  %v3772_v14 = vld [vmem:[#allocation2 + $0x264] ss:$16 sps:$4 sm:$0xff]   ;;  %v3775_v15 = vld [vmem:[#allocation2 + $0x26c] ss:$16 sps:$4 sm:$0xff]  }
  0x51   :  { %1492 = vmatprep.subr.bf16.mxu0 %v3695_v28  ;;  %1664 = vmatprep.subr.bf16.mxu1 %v3697_v29  ;;  %v3770_v16 = vld [vmem:[#allocation2 + $0x260] ss:$16 sps:$4 sm:$0xff]   ;;  %v3773_v17 = vld [vmem:[#allocation2 + $0x268] ss:$16 sps:$4 sm:$0xff]   ;;  %v3778_v18 = vld [vmem:[#allocation2 + $0x284] ss:$16 sps:$4 sm:$0xff]  }
  0x52   :  { %v3781_v19 = vld [vmem:[#allocation2 + $0x28c] ss:$16 sps:$4 sm:$0xff]   ;;  %v3776_v20 = vld [vmem:[#allocation2 + $0x280] ss:$16 sps:$4 sm:$0xff]   ;;  %v3779_v21 = vld [vmem:[#allocation2 + $0x288] ss:$16 sps:$4 sm:$0xff]  }
  0x53   :  { %v3784_v22 = vld [vmem:[#allocation2 + $0x2a4] ss:$16 sps:$4 sm:$0xff]   ;;  %v3787_v23 = vld [vmem:[#allocation2 + $0x2ac] ss:$16 sps:$4 sm:$0xff]   ;;  %v3782_v24 = vld [vmem:[#allocation2 + $0x2a0] ss:$16 sps:$4 sm:$0xff]  }
  0x54   :  { %1493 = vmatpush1.bf16.msra.mxu0 %v3699_v30  ;;  %1665 = vmatpush1.bf16.msra.mxu1 %v3700_v31  ;;  %v3785_v25 = vld [vmem:[#allocation2 + $0x2a8] ss:$16 sps:$4 sm:$0xff]   ;;  %v3790_v26 = vld [vmem:[#allocation2 + $0x2c4] ss:$16 sps:$4 sm:$0xff]   ;;  %v3793_v27 = vld [vmem:[#allocation2 + $0x2cc] ss:$16 sps:$4 sm:$0xff]  }
  0x55   :  { %1494 = vmatprep.subr.bf16.mxu0 %v3701_v32  ;;  %1666 = vmatprep.subr.bf16.mxu1 %v3703_v33  ;;  %v3788_v28 = vld [vmem:[#allocation2 + $0x2c0] ss:$16 sps:$4 sm:$0xff]   ;;  %v3791_v29 = vld [vmem:[#allocation2 + $0x2c8] ss:$16 sps:$4 sm:$0xff]   ;;  %v3796_v31 = vld [vmem:[#allocation2 + $0x2e4] ss:$16 sps:$4 sm:$0xff]  }
  0x56   :  { %v3850_v30 = vld [vmem:[%s4446_s0 + $0xc] ss:$28 sps:$4 sm:$0xff]   ;;  %v3794_v33 = vld [vmem:[#allocation2 + $0x2e0] ss:$16 sps:$4 sm:$0xff]  }
  0x57   :  { %v3799_v32 = vld [vmem:[#allocation2 + $0x2ec] ss:$16 sps:$4 sm:$0xff]  }
  0x58   :  { %1495 = vmatpush1.bf16.msra.mxu0 %v3705_v34  ;;  %1667 = vmatpush1.bf16.msra.mxu1 %v3706_v35  ;;  %v3797_v34 = vld [vmem:[#allocation2 + $0x2e8] ss:$16 sps:$4 sm:$0xff]   ;;  %v3802_v35 = vld [vmem:[#allocation2 + $0x304] ss:$16 sps:$4 sm:$0xff]   ;;  %v3823_v48 = vld [vmem:[#allocation2 + $0x36c] ss:$16 sps:$4 sm:$0xff]  }
  0x59   :  { %1496 = vmatprep.subr.bf16.mxu0 %v3707_v36  ;;  %1668 = vmatprep.subr.bf16.mxu1 %v3709_v37  ;;  %v3805_v36 = vld [vmem:[#allocation2 + $0x30c] ss:$16 sps:$4 sm:$0xff]   ;;  %v3800_v37 = vld [vmem:[#allocation2 + $0x300] ss:$16 sps:$4 sm:$0xff]  }
  0x5c   :  { %1497 = vmatpush1.bf16.msra.mxu0 %v3711_v38  ;;  %1669 = vmatpush1.bf16.msra.mxu1 %v3712_v39  ;;  %v3803_v38 = vld [vmem:[#allocation2 + $0x308] ss:$16 sps:$4 sm:$0xff]   ;;  %v3808_v39 = vld [vmem:[#allocation2 + $0x324] ss:$16 sps:$4 sm:$0xff]  }
  0x5d   :  { %1498 = vmatprep.subr.bf16.mxu0 %v3713_v40  ;;  %1670 = vmatprep.subr.bf16.mxu1 %v3715_v41  ;;  %v3811_v40 = vld [vmem:[#allocation2 + $0x32c] ss:$16 sps:$4 sm:$0xff]   ;;  %v3806_v41 = vld [vmem:[#allocation2 + $0x320] ss:$16 sps:$4 sm:$0xff]  }
  0x60   :  { %1499 = vmatpush1.bf16.msra.mxu0 %v3717_v42  ;;  %1671 = vmatpush1.bf16.msra.mxu1 %v3718_v43  ;;  %v3809_v42 = vld [vmem:[#allocation2 + $0x328] ss:$16 sps:$4 sm:$0xff]   ;;  %v3814_v43 = vld [vmem:[#allocation2 + $0x344] ss:$16 sps:$4 sm:$0xff]  }
  0x61   :  { %1500 = vmatprep.subr.bf16.mxu0 %v3719_v44  ;;  %1672 = vmatprep.subr.bf16.mxu1 %v3721_v45  ;;  %v3817_v44 = vld [vmem:[#allocation2 + $0x34c] ss:$16 sps:$4 sm:$0xff]   ;;  %v3812_v45 = vld [vmem:[#allocation2 + $0x340] ss:$16 sps:$4 sm:$0xff]  }
  0x64   :  { %1501 = vmatpush1.bf16.msra.mxu0 %v3723_v46  ;;  %1673 = vmatpush1.bf16.msra.mxu1 %v3724_v47  ;;  %v3815_v46 = vld [vmem:[#allocation2 + $0x348] ss:$16 sps:$4 sm:$0xff]   ;;  %v3820_v47 = vld [vmem:[#allocation2 + $0x364] ss:$16 sps:$4 sm:$0xff]  }
  0x65   :  { %1502 = vmatprep.subr.bf16.mxu0 %v3725_v49  ;;  %1674 = vmatprep.subr.bf16.mxu1 %v3727_v50  ;;  %v3818_v49 = vld [vmem:[#allocation2 + $0x360] ss:$16 sps:$4 sm:$0xff]   ;;  %v3821_v50 = vld [vmem:[#allocation2 + $0x368] ss:$16 sps:$4 sm:$0xff]  }
  0x68   :  { %1503 = vmatpush1.bf16.msra.mxu0 %v3729_v51  ;;  %1675 = vmatpush1.bf16.msra.mxu1 %v3730_v52  ;;  %v3826_v51 = vld [vmem:[#allocation2 + $0x384] ss:$16 sps:$4 sm:$0xff]   ;;  %v3829_v52 = vld [vmem:[#allocation2 + $0x38c] ss:$16 sps:$4 sm:$0xff]  }
  0x69   :  { %1504 = vmatprep.subr.bf16.mxu0 %v3731_v53  ;;  %1676 = vmatprep.subr.bf16.mxu1 %v3733_v54  ;;  %v3824_v53 = vld [vmem:[#allocation2 + $0x380] ss:$16 sps:$4 sm:$0xff]   ;;  %v3827_v54 = vld [vmem:[#allocation2 + $0x388] ss:$16 sps:$4 sm:$0xff]  }
  0x6c   :  { %1505 = vmatpush1.bf16.msra.mxu0 %v3735_v55  ;;  %1677 = vmatpush1.bf16.msra.mxu1 %v3736_v56  ;;  %v3832_v55 = vld [vmem:[#allocation2 + $0x3a4] ss:$16 sps:$4 sm:$0xff]   ;;  %v3835_v56 = vld [vmem:[#allocation2 + $0x3ac] ss:$16 sps:$4 sm:$0xff]  }
  0x6d   :  { %1506 = vmatprep.subr.bf16.mxu0 %v3737_v57  ;;  %1678 = vmatprep.subr.bf16.mxu1 %v3739_v58  ;;  %v3830_v57 = vld [vmem:[#allocation2 + $0x3a0] ss:$16 sps:$4 sm:$0xff]   ;;  %v3833_v58 = vld [vmem:[#allocation2 + $0x3a8] ss:$16 sps:$4 sm:$0xff]  }
  0x70   :  { %1507 = vmatpush1.bf16.msra.mxu0 %v3741_v59  ;;  %1679 = vmatpush1.bf16.msra.mxu1 %v3742_v60  ;;  %v3838_v59 = vld [vmem:[#allocation2 + $0x3c4] ss:$16 sps:$4 sm:$0xff]   ;;  %v3841_v60 = vld [vmem:[#allocation2 + $0x3cc] ss:$16 sps:$4 sm:$0xff]  }
  0x71   :  { %1508 = vmatprep.subr.bf16.mxu0 %v3743_v61  ;;  %1680 = vmatprep.subr.bf16.mxu1 %v3745_v62  ;;  %v3836_v61 = vld [vmem:[#allocation2 + $0x3c0] ss:$16 sps:$4 sm:$0xff]   ;;  %v3839_v62 = vld [vmem:[#allocation2 + $0x3c8] ss:$16 sps:$4 sm:$0xff]  }
  0x74   :  { %1509 = vmatpush1.bf16.msra.mxu0 %v3747_v63  ;;  %1681 = vmatpush1.bf16.msra.mxu1 %v3748_v0  ;;  %v3844_v63 = vld [vmem:[#allocation2 + $0x3e4] ss:$16 sps:$4 sm:$0xff]   ;;  %v3847_v0 = vld [vmem:[#allocation2 + $0x3ec] ss:$16 sps:$4 sm:$0xff]  }
  0x75   :  { %1521 = vmatprep.subr.bf16.mxu0 %v3754_v1  ;;  %1693 = vmatprep.subr.bf16.mxu1 %v3757_v2  ;;  %v3842_v1 = vld [vmem:[#allocation2 + $0x3e0] ss:$16 sps:$4 sm:$0xff]   ;;  %v3845_v2 = vld [vmem:[#allocation2 + $0x3e8] ss:$16 sps:$4 sm:$0xff]  }
  0x77   :  { %1511 = vmatmul.mubr.bf16.vlgmr.msra.gmra.mrb[0].mxu0 %v3749_v3  ;;  %1683 = vmatmul.mubr.bf16.vlgmr.msra.gmra.mrb[0].mxu1 %v3749_v3  ;;  %v3853_v3 = vld [vmem:[#allocation2 + $0x404] ss:$16 sps:$4 sm:$0xff]  }
  0x78   :  { %1522 = vmatpush1.bf16.msra.mxu0 %v3752_v4  ;;  %1694 = vmatpush1.bf16.msra.mxu1 %v3755_v5  ;;  %v3856_v4 = vld [vmem:[#allocation2 + $0x40c] ss:$16 sps:$4 sm:$0xff]   ;;  %v3848_v5 = vld [vmem:[%s4446_s0 + $0x8] ss:$28 sps:$4 sm:$0xff]  }
  0x79   :  { %1523 = vmatprep.subr.bf16.mxu0 %v3760_v6  ;;  %1695 = vmatprep.subr.bf16.mxu1 %v3763_v7  ;;  %v3851_v6 = vld [vmem:[#allocation2 + $0x400] ss:$16 sps:$4 sm:$0xff]   ;;  %v3854_v7 = vld [vmem:[#allocation2 + $0x408] ss:$16 sps:$4 sm:$0xff]  }
  0x7a   :  { %1553 = vmatprep.mubr.bf16.mxu0 %v3850_v30  ;;  %1725 = vmatprep.mubr.bf16.mxu1 %v3850_v30  ;;  %v3892_v30 = vld [vmem:[#allocation2 + $0x4cc] ss:$16 sps:$4 sm:$0xff]  }
  0x7c   :  { %1524 = vmatpush1.bf16.msra.mxu0 %v3758_v8  ;;  %1696 = vmatpush1.bf16.msra.mxu1 %v3761_v9  ;;  %v3859_v8 = vld [vmem:[#allocation2 + $0x424] ss:$16 sps:$4 sm:$0xff]   ;;  %v3862_v9 = vld [vmem:[#allocation2 + $0x42c] ss:$16 sps:$4 sm:$0xff]  }
  0x7d   :  { %1525 = vmatprep.subr.bf16.mxu0 %v3766_v10  ;;  %1697 = vmatprep.subr.bf16.mxu1 %v3769_v11  ;;  %v3857_v10 = vld [vmem:[#allocation2 + $0x420] ss:$16 sps:$4 sm:$0xff]   ;;  %v3860_v11 = vld [vmem:[#allocation2 + $0x428] ss:$16 sps:$4 sm:$0xff]  }
  0x80   :  { %1526 = vmatpush1.bf16.msra.mxu0 %v3764_v12  ;;  %1698 = vmatpush1.bf16.msra.mxu1 %v3767_v13  ;;  %v3949_v12 = vld [vmem:[%s4446_s0 + $0x14] ss:$28 sps:$4 sm:$0xff]  }
  0x81   :  { %1527 = vmatprep.subr.bf16.mxu0 %v3772_v14  ;;  %1699 = vmatprep.subr.bf16.mxu1 %v3775_v15  ;;  %v3865_v13 = vld [vmem:[#allocation2 + $0x444] ss:$16 sps:$4 sm:$0xff]   ;;  %v3868_v14 = vld [vmem:[#allocation2 + $0x44c] ss:$16 sps:$4 sm:$0xff]   ;;  %v3863_v15 = vld [vmem:[#allocation2 + $0x440] ss:$16 sps:$4 sm:$0xff]  }
  0x84   :  { %1528 = vmatpush1.bf16.msra.mxu0 %v3770_v16  ;;  %1700 = vmatpush1.bf16.msra.mxu1 %v3773_v17  ;;  %v3866_v16 = vld [vmem:[#allocation2 + $0x448] ss:$16 sps:$4 sm:$0xff]   ;;  %v3871_v17 = vld [vmem:[#allocation2 + $0x464] ss:$16 sps:$4 sm:$0xff]  }
  0x85   :  { %1529 = vmatprep.subr.bf16.mxu0 %v3778_v18  ;;  %1701 = vmatprep.subr.bf16.mxu1 %v3781_v19  ;;  %v3874_v18 = vld [vmem:[#allocation2 + $0x46c] ss:$16 sps:$4 sm:$0xff]   ;;  %v3869_v19 = vld [vmem:[#allocation2 + $0x460] ss:$16 sps:$4 sm:$0xff]  }
  0x88   :  { %1530 = vmatpush1.bf16.msra.mxu0 %v3776_v20  ;;  %1702 = vmatpush1.bf16.msra.mxu1 %v3779_v21  ;;  %v3872_v20 = vld [vmem:[#allocation2 + $0x468] ss:$16 sps:$4 sm:$0xff]   ;;  %v3877_v21 = vld [vmem:[#allocation2 + $0x484] ss:$16 sps:$4 sm:$0xff]  }
  0x89   :  { %1531 = vmatprep.subr.bf16.mxu0 %v3784_v22  ;;  %1703 = vmatprep.subr.bf16.mxu1 %v3787_v23  ;;  %v3880_v22 = vld [vmem:[#allocation2 + $0x48c] ss:$16 sps:$4 sm:$0xff]   ;;  %v3875_v23 = vld [vmem:[#allocation2 + $0x480] ss:$16 sps:$4 sm:$0xff]  }
  0x8c   :  { %1532 = vmatpush1.bf16.msra.mxu0 %v3782_v24  ;;  %1704 = vmatpush1.bf16.msra.mxu1 %v3785_v25  ;;  %v3878_v24 = vld [vmem:[#allocation2 + $0x488] ss:$16 sps:$4 sm:$0xff]   ;;  %v3883_v25 = vld [vmem:[#allocation2 + $0x4a4] ss:$16 sps:$4 sm:$0xff]  }
  0x8d   :  { %1533 = vmatprep.subr.bf16.mxu0 %v3790_v26  ;;  %1705 = vmatprep.subr.bf16.mxu1 %v3793_v27  ;;  %v3886_v26 = vld [vmem:[#allocation2 + $0x4ac] ss:$16 sps:$4 sm:$0xff]   ;;  %v3881_v27 = vld [vmem:[#allocation2 + $0x4a0] ss:$16 sps:$4 sm:$0xff]  }
  0x90   :  { %1534 = vmatpush1.bf16.msra.mxu0 %v3788_v28  ;;  %1706 = vmatpush1.bf16.msra.mxu1 %v3791_v29  ;;  %v3884_v28 = vld [vmem:[#allocation2 + $0x4a8] ss:$16 sps:$4 sm:$0xff]   ;;  %v3889_v29 = vld [vmem:[#allocation2 + $0x4c4] ss:$16 sps:$4 sm:$0xff]  }
  0x91   :  { %1535 = vmatprep.subr.bf16.mxu0 %v3796_v31  ;;  %1707 = vmatprep.subr.bf16.mxu1 %v3799_v32  ;;  %v3887_v31 = vld [vmem:[#allocation2 + $0x4c0] ss:$16 sps:$4 sm:$0xff]   ;;  %v3890_v32 = vld [vmem:[#allocation2 + $0x4c8] ss:$16 sps:$4 sm:$0xff]  }
  0x94   :  { %1536 = vmatpush1.bf16.msra.mxu0 %v3794_v33  ;;  %1708 = vmatpush1.bf16.msra.mxu1 %v3797_v34  ;;  %v3895_v33 = vld [vmem:[#allocation2 + $0x4e4] ss:$16 sps:$4 sm:$0xff]   ;;  %v3898_v34 = vld [vmem:[#allocation2 + $0x4ec] ss:$16 sps:$4 sm:$0xff]  }
  0x95   :  { %1537 = vmatprep.subr.bf16.mxu0 %v3802_v35  ;;  %1709 = vmatprep.subr.bf16.mxu1 %v3805_v36  ;;  %v3893_v35 = vld [vmem:[#allocation2 + $0x4e0] ss:$16 sps:$4 sm:$0xff]   ;;  %v3896_v36 = vld [vmem:[#allocation2 + $0x4e8] ss:$16 sps:$4 sm:$0xff]  }
  0x98   :  { %1538 = vmatpush1.bf16.msra.mxu0 %v3800_v37  ;;  %1710 = vmatpush1.bf16.msra.mxu1 %v3803_v38  ;;  %v3901_v37 = vld [vmem:[#allocation2 + $0x504] ss:$16 sps:$4 sm:$0xff]   ;;  %v3904_v38 = vld [vmem:[#allocation2 + $0x50c] ss:$16 sps:$4 sm:$0xff]  }
  0x99   :  { %1539 = vmatprep.subr.bf16.mxu0 %v3808_v39  ;;  %1711 = vmatprep.subr.bf16.mxu1 %v3811_v40  ;;  %v3899_v39 = vld [vmem:[#allocation2 + $0x500] ss:$16 sps:$4 sm:$0xff]   ;;  %v3902_v40 = vld [vmem:[#allocation2 + $0x508] ss:$16 sps:$4 sm:$0xff]  }
  0x9c   :  { %1540 = vmatpush1.bf16.msra.mxu0 %v3806_v41  ;;  %1712 = vmatpush1.bf16.msra.mxu1 %v3809_v42  ;;  %v3907_v41 = vld [vmem:[#allocation2 + $0x524] ss:$16 sps:$4 sm:$0xff]   ;;  %v3910_v42 = vld [vmem:[#allocation2 + $0x52c] ss:$16 sps:$4 sm:$0xff]  }
  0x9d   :  { %1541 = vmatprep.subr.bf16.mxu0 %v3814_v43  ;;  %1713 = vmatprep.subr.bf16.mxu1 %v3817_v44  ;;  %v3905_v43 = vld [vmem:[#allocation2 + $0x520] ss:$16 sps:$4 sm:$0xff]   ;;  %v3908_v44 = vld [vmem:[#allocation2 + $0x528] ss:$16 sps:$4 sm:$0xff]  }
  0xa0   :  { %1542 = vmatpush1.bf16.msra.mxu0 %v3812_v45  ;;  %1714 = vmatpush1.bf16.msra.mxu1 %v3815_v46  ;;  %v3913_v45 = vld [vmem:[#allocation2 + $0x544] ss:$16 sps:$4 sm:$0xff]   ;;  %v3916_v46 = vld [vmem:[#allocation2 + $0x54c] ss:$16 sps:$4 sm:$0xff]  }
  0xa1   :  { %1543 = vmatprep.subr.bf16.mxu0 %v3820_v47  ;;  %1715 = vmatprep.subr.bf16.mxu1 %v3823_v48  ;;  %v3911_v47 = vld [vmem:[#allocation2 + $0x540] ss:$16 sps:$4 sm:$0xff]   ;;  %v3914_v48 = vld [vmem:[#allocation2 + $0x548] ss:$16 sps:$4 sm:$0xff]  }
  0xa4   :  { %1544 = vmatpush1.bf16.msra.mxu0 %v3818_v49  ;;  %1716 = vmatpush1.bf16.msra.mxu1 %v3821_v50  ;;  %v3919_v49 = vld [vmem:[#allocation2 + $0x564] ss:$16 sps:$4 sm:$0xff]   ;;  %v3922_v50 = vld [vmem:[#allocation2 + $0x56c] ss:$16 sps:$4 sm:$0xff]  }
  0xa5   :  { %1545 = vmatprep.subr.bf16.mxu0 %v3826_v51  ;;  %1717 = vmatprep.subr.bf16.mxu1 %v3829_v52  ;;  %v3917_v51 = vld [vmem:[#allocation2 + $0x560] ss:$16 sps:$4 sm:$0xff]   ;;  %v3920_v52 = vld [vmem:[#allocation2 + $0x568] ss:$16 sps:$4 sm:$0xff]  }
  0xa8   :  { %1546 = vmatpush1.bf16.msra.mxu0 %v3824_v53  ;;  %1718 = vmatpush1.bf16.msra.mxu1 %v3827_v54  ;;  %v3925_v53 = vld [vmem:[#allocation2 + $0x584] ss:$16 sps:$4 sm:$0xff]   ;;  %v3928_v54 = vld [vmem:[#allocation2 + $0x58c] ss:$16 sps:$4 sm:$0xff]  }
  0xa9   :  { %1547 = vmatprep.subr.bf16.mxu0 %v3832_v55  ;;  %1719 = vmatprep.subr.bf16.mxu1 %v3835_v56  ;;  %v3923_v55 = vld [vmem:[#allocation2 + $0x580] ss:$16 sps:$4 sm:$0xff]   ;;  %v3926_v56 = vld [vmem:[#allocation2 + $0x588] ss:$16 sps:$4 sm:$0xff]  }
  0xac   :  { %1548 = vmatpush1.bf16.msra.mxu0 %v3830_v57  ;;  %1720 = vmatpush1.bf16.msra.mxu1 %v3833_v58  ;;  %v3931_v57 = vld [vmem:[#allocation2 + $0x5a4] ss:$16 sps:$4 sm:$0xff]   ;;  %v3934_v58 = vld [vmem:[#allocation2 + $0x5ac] ss:$16 sps:$4 sm:$0xff]  }
  0xad   :  { %1549 = vmatprep.subr.bf16.mxu0 %v3838_v59  ;;  %1721 = vmatprep.subr.bf16.mxu1 %v3841_v60  ;;  %v3929_v59 = vld [vmem:[#allocation2 + $0x5a0] ss:$16 sps:$4 sm:$0xff]   ;;  %v3932_v60 = vld [vmem:[#allocation2 + $0x5a8] ss:$16 sps:$4 sm:$0xff]  }
  0xb0   :  { %1550 = vmatpush1.bf16.msra.mxu0 %v3836_v61  ;;  %1722 = vmatpush1.bf16.msra.mxu1 %v3839_v62  ;;  %v3937_v61 = vld [vmem:[#allocation2 + $0x5c4] ss:$16 sps:$4 sm:$0xff]   ;;  %v3940_v62 = vld [vmem:[#allocation2 + $0x5cc] ss:$16 sps:$4 sm:$0xff]  }
  0xb1   :  { %1551 = vmatprep.subr.bf16.mxu0 %v3844_v63  ;;  %1723 = vmatprep.subr.bf16.mxu1 %v3847_v0  ;;  %v3935_v63 = vld [vmem:[#allocation2 + $0x5c0] ss:$16 sps:$4 sm:$0xff]   ;;  %v3938_v0 = vld [vmem:[#allocation2 + $0x5c8] ss:$16 sps:$4 sm:$0xff]  }
  0xb4   :  { %1552 = vmatpush1.bf16.msra.mxu0 %v3842_v1  ;;  %1724 = vmatpush1.bf16.msra.mxu1 %v3845_v2  ;;  %v3943_v1 = vld [vmem:[#allocation2 + $0x5e4] ss:$16 sps:$4 sm:$0xff]   ;;  %v3946_v2 = vld [vmem:[#allocation2 + $0x5ec] ss:$16 sps:$4 sm:$0xff]  }
  0xb5   :  { %1564 = vmatprep.subr.bf16.mxu0 %v3853_v3  ;;  %1736 = vmatprep.subr.bf16.mxu1 %v3856_v4  ;;  %v3941_v3 = vld [vmem:[#allocation2 + $0x5e0] ss:$16 sps:$4 sm:$0xff]   ;;  %v3944_v4 = vld [vmem:[#allocation2 + $0x5e8] ss:$16 sps:$4 sm:$0xff]  }
  0xb7   :  { %1554 = vmatmul.mubr.bf16.vlgmr.msra.gmra.mrb[0].mxu0 %v3848_v5  ;;  %1726 = vmatmul.mubr.bf16.vlgmr.msra.gmra.mrb[0].mxu1 %v3848_v5  ;;  %v3952_v5 = vld [vmem:[#allocation2 + $0x604] ss:$16 sps:$4 sm:$0xff]  }
  0xb8   :  { %1565 = vmatpush1.bf16.msra.mxu0 %v3851_v6  ;;  %1737 = vmatpush1.bf16.msra.mxu1 %v3854_v7  ;;  %v3947_v6 = vld [vmem:[%s4446_s0 + $0x10] ss:$28 sps:$4 sm:$0xff]  }
  0xb9   :  { %1566 = vmatprep.subr.bf16.mxu0 %v3859_v8  ;;  %1738 = vmatprep.subr.bf16.mxu1 %v3862_v9  ;;  %v3955_v7 = vld [vmem:[#allocation2 + $0x60c] ss:$16 sps:$4 sm:$0xff]   ;;  %v3950_v8 = vld [vmem:[#allocation2 + $0x600] ss:$16 sps:$4 sm:$0xff]   ;;  %v3953_v9 = vld [vmem:[#allocation2 + $0x608] ss:$16 sps:$4 sm:$0xff]  }
  0xba   :  { %1596 = vmatprep.mubr.bf16.mxu0 %v3949_v12  ;;  %1768 = vmatprep.mubr.bf16.mxu1 %v3949_v12  ;;  %v3956_v12 = vld [vmem:[#allocation2 + $0x620] ss:$16 sps:$4 sm:$0xff]  }
  0xbc   :  { %1567 = vmatpush1.bf16.msra.mxu0 %v3857_v10  ;;  %1739 = vmatpush1.bf16.msra.mxu1 %v3860_v11  ;;  %v3958_v10 = vld [vmem:[#allocation2 + $0x624] ss:$16 sps:$4 sm:$0xff]   ;;  %v3961_v11 = vld [vmem:[#allocation2 + $0x62c] ss:$16 sps:$4 sm:$0xff]  }
  0xbd   :  { %1568 = vmatprep.subr.bf16.mxu0 %v3865_v13  ;;  %1740 = vmatprep.subr.bf16.mxu1 %v3868_v14  ;;  %v3959_v13 = vld [vmem:[#allocation2 + $0x628] ss:$16 sps:$4 sm:$0xff]   ;;  %v3964_v14 = vld [vmem:[#allocation2 + $0x644] ss:$16 sps:$4 sm:$0xff]  }
  0xc0   :  { %1569 = vmatpush1.bf16.msra.mxu0 %v3863_v15  ;;  %1741 = vmatpush1.bf16.msra.mxu1 %v3866_v16  ;;  %v3967_v15 = vld [vmem:[#allocation2 + $0x64c] ss:$16 sps:$4 sm:$0xff]   ;;  %v3962_v16 = vld [vmem:[#allocation2 + $0x640] ss:$16 sps:$4 sm:$0xff]  }
  0xc1   :  { %1570 = vmatprep.subr.bf16.mxu0 %v3871_v17  ;;  %1742 = vmatprep.subr.bf16.mxu1 %v3874_v18  ;;  %v3965_v17 = vld [vmem:[#allocation2 + $0x648] ss:$16 sps:$4 sm:$0xff]   ;;  %v4300_v18 = vmov 0  }
  0xc4   :  { %1571 = vmatpush1.bf16.msra.mxu0 %v3869_v19  ;;  %1743 = vmatpush1.bf16.msra.mxu1 %v3872_v20  ;;  %v3970_v19 = vld [vmem:[#allocation2 + $0x664] ss:$16 sps:$4 sm:$0xff]   ;;  %v3973_v20 = vld [vmem:[#allocation2 + $0x66c] ss:$16 sps:$4 sm:$0xff]  }
  0xc5   :  { %1572 = vmatprep.subr.bf16.mxu0 %v3877_v21  ;;  %1744 = vmatprep.subr.bf16.mxu1 %v3880_v22  ;;  %v3968_v21 = vld [vmem:[#allocation2 + $0x660] ss:$16 sps:$4 sm:$0xff]   ;;  %v3971_v22 = vld [vmem:[#allocation2 + $0x668] ss:$16 sps:$4 sm:$0xff]  }
  0xc8   :  { %1573 = vmatpush1.bf16.msra.mxu0 %v3875_v23  ;;  %1745 = vmatpush1.bf16.msra.mxu1 %v3878_v24  ;;  %v3976_v23 = vld [vmem:[#allocation2 + $0x684] ss:$16 sps:$4 sm:$0xff]   ;;  %v3979_v24 = vld [vmem:[#allocation2 + $0x68c] ss:$16 sps:$4 sm:$0xff]  }
  0xc9   :  { %1574 = vmatprep.subr.bf16.mxu0 %v3883_v25  ;;  %1746 = vmatprep.subr.bf16.mxu1 %v3886_v26  ;;  %v3974_v25 = vld [vmem:[#allocation2 + $0x680] ss:$16 sps:$4 sm:$0xff]   ;;  %v3977_v26 = vld [vmem:[#allocation2 + $0x688] ss:$16 sps:$4 sm:$0xff]  }
  0xcc   :  { %1575 = vmatpush1.bf16.msra.mxu0 %v3881_v27  ;;  %1747 = vmatpush1.bf16.msra.mxu1 %v3884_v28  ;;  %v3982_v27 = vld [vmem:[#allocation2 + $0x6a4] ss:$16 sps:$4 sm:$0xff]   ;;  %v3985_v28 = vld [vmem:[#allocation2 + $0x6ac] ss:$16 sps:$4 sm:$0xff]  }
  0xcd   :  { %1576 = vmatprep.subr.bf16.mxu0 %v3889_v29  ;;  %1748 = vmatprep.subr.bf16.mxu1 %v3892_v30  ;;  %v3980_v29 = vld [vmem:[#allocation2 + $0x6a0] ss:$16 sps:$4 sm:$0xff]   ;;  %v3983_v30 = vld [vmem:[#allocation2 + $0x6a8] ss:$16 sps:$4 sm:$0xff]  }
  0xd0   :  { %1577 = vmatpush1.bf16.msra.mxu0 %v3887_v31  ;;  %1749 = vmatpush1.bf16.msra.mxu1 %v3890_v32  ;;  %v3988_v31 = vld [vmem:[#allocation2 + $0x6c4] ss:$16 sps:$4 sm:$0xff]   ;;  %v3991_v32 = vld [vmem:[#allocation2 + $0x6cc] ss:$16 sps:$4 sm:$0xff]  }
  0xd1   :  { %1578 = vmatprep.subr.bf16.mxu0 %v3895_v33  ;;  %1750 = vmatprep.subr.bf16.mxu1 %v3898_v34  ;;  %v3986_v33 = vld [vmem:[#allocation2 + $0x6c0] ss:$16 sps:$4 sm:$0xff]   ;;  %v3989_v34 = vld [vmem:[#allocation2 + $0x6c8] ss:$16 sps:$4 sm:$0xff]  }
  0xd4   :  { %1579 = vmatpush1.bf16.msra.mxu0 %v3893_v35  ;;  %1751 = vmatpush1.bf16.msra.mxu1 %v3896_v36  ;;  %v3994_v35 = vld [vmem:[#allocation2 + $0x6e4] ss:$16 sps:$4 sm:$0xff]   ;;  %v3997_v36 = vld [vmem:[#allocation2 + $0x6ec] ss:$16 sps:$4 sm:$0xff]  }
  0xd5   :  { %1580 = vmatprep.subr.bf16.mxu0 %v3901_v37  ;;  %1752 = vmatprep.subr.bf16.mxu1 %v3904_v38  ;;  %v3992_v37 = vld [vmem:[#allocation2 + $0x6e0] ss:$16 sps:$4 sm:$0xff]   ;;  %v3995_v38 = vld [vmem:[#allocation2 + $0x6e8] ss:$16 sps:$4 sm:$0xff]  }
  0xd8   :  { %1581 = vmatpush1.bf16.msra.mxu0 %v3899_v39  ;;  %1753 = vmatpush1.bf16.msra.mxu1 %v3902_v40  ;;  %v4001_v39 = vld [vmem:[#allocation4 + $0x4] ss:$16 sps:$4 sm:$0xff]   ;;  %v4004_v40 = vld [vmem:[#allocation4 + $0xc] ss:$16 sps:$4 sm:$0xff]  }
  0xd9   :  { %1582 = vmatprep.subr.bf16.mxu0 %v3907_v41  ;;  %1754 = vmatprep.subr.bf16.mxu1 %v3910_v42  ;;  %v3998_v41 = vld [vmem:[%s4446_s0 + $0x18] ss:$28 sps:$4 sm:$0xff]   ;;  %v3999_v42 = vld [vmem:[#allocation4] ss:$16 sps:$4 sm:$0xff]  }
  0xdc   :  { %1583 = vmatpush1.bf16.msra.mxu0 %v3905_v43  ;;  %1755 = vmatpush1.bf16.msra.mxu1 %v3908_v44  ;;  %v4002_v43 = vld [vmem:[#allocation4 + $0x8] ss:$16 sps:$4 sm:$0xff]   ;;  %v4007_v44 = vld [vmem:[#allocation4 + $0x24] ss:$16 sps:$4 sm:$0xff]  }
  0xdd   :  { %1584 = vmatprep.subr.bf16.mxu0 %v3913_v45  ;;  %1756 = vmatprep.subr.bf16.mxu1 %v3916_v46  ;;  %v4010_v45 = vld [vmem:[#allocation4 + $0x2c] ss:$16 sps:$4 sm:$0xff]   ;;  %v4005_v46 = vld [vmem:[#allocation4 + $0x20] ss:$16 sps:$4 sm:$0xff]  }
  0xe0   :  { %1585 = vmatpush1.bf16.msra.mxu0 %v3911_v47  ;;  %1757 = vmatpush1.bf16.msra.mxu1 %v3914_v48  ;;  %v4008_v47 = vld [vmem:[#allocation4 + $0x28] ss:$16 sps:$4 sm:$0xff]   ;;  %v4013_v48 = vld [vmem:[#allocation4 + $0x44] ss:$16 sps:$4 sm:$0xff]  }
  0xe1   :  { %1586 = vmatprep.subr.bf16.mxu0 %v3919_v49  ;;  %1758 = vmatprep.subr.bf16.mxu1 %v3922_v50  ;;  %v4016_v49 = vld [vmem:[#allocation4 + $0x4c] ss:$16 sps:$4 sm:$0xff]   ;;  %v4011_v50 = vld [vmem:[#allocation4 + $0x40] ss:$16 sps:$4 sm:$0xff]  }
  0xe4   :  { %1587 = vmatpush1.bf16.msra.mxu0 %v3917_v51  ;;  %1759 = vmatpush1.bf16.msra.mxu1 %v3920_v52  ;;  %v4014_v51 = vld [vmem:[#allocation4 + $0x48] ss:$16 sps:$4 sm:$0xff]   ;;  %v4019_v52 = vld [vmem:[#allocation4 + $0x64] ss:$16 sps:$4 sm:$0xff]  }
  0xe5   :  { %1588 = vmatprep.subr.bf16.mxu0 %v3925_v53  ;;  %1760 = vmatprep.subr.bf16.mxu1 %v3928_v54  ;;  %v4022_v53 = vld [vmem:[#allocation4 + $0x6c] ss:$16 sps:$4 sm:$0xff]   ;;  %v4017_v54 = vld [vmem:[#allocation4 + $0x60] ss:$16 sps:$4 sm:$0xff]  }
  0xe8   :  { %1589 = vmatpush1.bf16.msra.mxu0 %v3923_v55  ;;  %1761 = vmatpush1.bf16.msra.mxu1 %v3926_v56  ;;  %v4020_v55 = vld [vmem:[#allocation4 + $0x68] ss:$16 sps:$4 sm:$0xff]   ;;  %v4025_v56 = vld [vmem:[#allocation4 + $0x84] ss:$16 sps:$4 sm:$0xff]  }
  0xe9   :  { %1590 = vmatprep.subr.bf16.mxu0 %v3931_v57  ;;  %1762 = vmatprep.subr.bf16.mxu1 %v3934_v58  ;;  %v4028_v57 = vld [vmem:[#allocation4 + $0x8c] ss:$16 sps:$4 sm:$0xff]   ;;  %v4023_v58 = vld [vmem:[#allocation4 + $0x80] ss:$16 sps:$4 sm:$0xff]  }
  0xec   :  { %1591 = vmatpush1.bf16.msra.mxu0 %v3929_v59  ;;  %1763 = vmatpush1.bf16.msra.mxu1 %v3932_v60  ;;  %v4026_v59 = vld [vmem:[#allocation4 + $0x88] ss:$16 sps:$4 sm:$0xff]   ;;  %v4031_v60 = vld [vmem:[#allocation4 + $0xa4] ss:$16 sps:$4 sm:$0xff]  }
  0xed   :  { %1592 = vmatprep.subr.bf16.mxu0 %v3937_v61  ;;  %1764 = vmatprep.subr.bf16.mxu1 %v3940_v62  ;;  %v4034_v61 = vld [vmem:[#allocation4 + $0xac] ss:$16 sps:$4 sm:$0xff]   ;;  %v4029_v62 = vld [vmem:[#allocation4 + $0xa0] ss:$16 sps:$4 sm:$0xff]  }
  0xf0   :  { %1593 = vmatpush1.bf16.msra.mxu0 %v3935_v63  ;;  %1765 = vmatpush1.bf16.msra.mxu1 %v3938_v0  ;;  %v4032_v63 = vld [vmem:[#allocation4 + $0xa8] ss:$16 sps:$4 sm:$0xff]   ;;  %v4037_v0 = vld [vmem:[#allocation4 + $0xc4] ss:$16 sps:$4 sm:$0xff]  }
  0xf1   :  { %1594 = vmatprep.subr.bf16.mxu0 %v3943_v1  ;;  %1766 = vmatprep.subr.bf16.mxu1 %v3946_v2  ;;  %v4040_v1 = vld [vmem:[#allocation4 + $0xcc] ss:$16 sps:$4 sm:$0xff]   ;;  %v4035_v2 = vld [vmem:[#allocation4 + $0xc0] ss:$16 sps:$4 sm:$0xff]  }
  0xf4   :  { %1595 = vmatpush1.bf16.msra.mxu0 %v3941_v3  ;;  %1767 = vmatpush1.bf16.msra.mxu1 %v3944_v4  ;;  %v4038_v3 = vld [vmem:[#allocation4 + $0xc8] ss:$16 sps:$4 sm:$0xff]   ;;  %v4043_v4 = vld [vmem:[#allocation4 + $0xe4] ss:$16 sps:$4 sm:$0xff]  }
  0xf5   :  { %1607 = vmatprep.subr.bf16.mxu0 %v3952_v5  ;;  %1779 = vmatprep.subr.bf16.mxu1 %v3955_v7  ;;  %v4046_v5 = vld [vmem:[#allocation4 + $0xec] ss:$16 sps:$4 sm:$0xff]   ;;  %v4044_v7 = vld [vmem:[#allocation4 + $0xe8] ss:$16 sps:$4 sm:$0xff]  }
  0xf7   :  { %1597 = vmatmul.mubr.bf16.vlgmr.msra.gmra.mrb[0].mxu0 %v3947_v6  ;;  %1769 = vmatmul.mubr.bf16.vlgmr.msra.gmra.mrb[0].mxu1 %v3947_v6  ;;  %v4041_v6 = vld [vmem:[#allocation4 + $0xe0] ss:$16 sps:$4 sm:$0xff]  }
  0xf8   :  { %1608 = vmatpush1.bf16.msra.mxu0 %v3950_v8  ;;  %1780 = vmatpush1.bf16.msra.mxu1 %v3953_v9  ;;  %v4049_v8 = vld [vmem:[#allocation4 + $0x104] ss:$16 sps:$4 sm:$0xff]   ;;  %v4052_v9 = vld [vmem:[#allocation4 + $0x10c] ss:$16 sps:$4 sm:$0xff]  }
  0xf9   :  { %1609 = vmatprep.subr.bf16.mxu0 %v3958_v10  ;;  %1781 = vmatprep.subr.bf16.mxu1 %v3961_v11  ;;  %v4047_v10 = vld [vmem:[#allocation4 + $0x100] ss:$16 sps:$4 sm:$0xff]   ;;  %v4050_v11 = vld [vmem:[#allocation4 + $0x108] ss:$16 sps:$4 sm:$0xff]  }
  0xfa   :  { %1639 = vmatprep.mubr.bf16.mxu0 %v4300_v18  ;;  %1811 = vmatprep.mubr.bf16.mxu1 %v4300_v18  ;;  %v4059_v18 = vld [vmem:[#allocation4 + $0x140] ss:$16 sps:$4 sm:$0xff]  }
  0xfc   :  { %1610 = vmatpush1.bf16.msra.mxu0 %v3956_v12  ;;  %1782 = vmatpush1.bf16.msra.mxu1 %v3959_v13  ;;  %v4055_v12 = vld [vmem:[#allocation4 + $0x124] ss:$16 sps:$4 sm:$0xff]   ;;  %v4058_v13 = vld [vmem:[#allocation4 + $0x12c] ss:$16 sps:$4 sm:$0xff]  }
  0xfd   :  { %1611 = vmatprep.subr.bf16.mxu0 %v3964_v14  ;;  %1783 = vmatprep.subr.bf16.mxu1 %v3967_v15  ;;  %v4053_v14 = vld [vmem:[#allocation4 + $0x120] ss:$16 sps:$4 sm:$0xff]   ;;  %v4056_v15 = vld [vmem:[#allocation4 + $0x128] ss:$16 sps:$4 sm:$0xff]  }
 0x100   :  { %1612 = vmatpush1.bf16.msra.mxu0 %v3962_v16  ;;  %1784 = vmatpush1.bf16.msra.mxu1 %v3965_v17  ;;  %v4061_v16 = vld [vmem:[#allocation4 + $0x144] ss:$16 sps:$4 sm:$0xff]   ;;  %v4064_v17 = vld [vmem:[#allocation4 + $0x14c] ss:$16 sps:$4 sm:$0xff]  }
 0x101   :  { %1613 = vmatprep.subr.bf16.mxu0 %v3970_v19  ;;  %1785 = vmatprep.subr.bf16.mxu1 %v3973_v20  ;;  %v4062_v19 = vld [vmem:[#allocation4 + $0x148] ss:$16 sps:$4 sm:$0xff]   ;;  %v4067_v20 = vld [vmem:[#allocation4 + $0x164] ss:$16 sps:$4 sm:$0xff]  }
 0x104   :  { %1614 = vmatpush1.bf16.msra.mxu0 %v3968_v21  ;;  %1786 = vmatpush1.bf16.msra.mxu1 %v3971_v22  ;;  %v4070_v21 = vld [vmem:[#allocation4 + $0x16c] ss:$16 sps:$4 sm:$0xff]   ;;  %v4065_v22 = vld [vmem:[#allocation4 + $0x160] ss:$16 sps:$4 sm:$0xff]  }
 0x105   :  { %1615 = vmatprep.subr.bf16.mxu0 %v3976_v23  ;;  %1787 = vmatprep.subr.bf16.mxu1 %v3979_v24  ;;  %v4068_v23 = vld [vmem:[#allocation4 + $0x168] ss:$16 sps:$4 sm:$0xff]   ;;  %v4073_v24 = vld [vmem:[#allocation4 + $0x184] ss:$16 sps:$4 sm:$0xff]  }
 0x108   :  { %1616 = vmatpush1.bf16.msra.mxu0 %v3974_v25  ;;  %1788 = vmatpush1.bf16.msra.mxu1 %v3977_v26  ;;  %v4076_v25 = vld [vmem:[#allocation4 + $0x18c] ss:$16 sps:$4 sm:$0xff]   ;;  %v4071_v26 = vld [vmem:[#allocation4 + $0x180] ss:$16 sps:$4 sm:$0xff]  }
 0x109   :  { %1617 = vmatprep.subr.bf16.mxu0 %v3982_v27  ;;  %1789 = vmatprep.subr.bf16.mxu1 %v3985_v28  ;;  %v4074_v27 = vld [vmem:[#allocation4 + $0x188] ss:$16 sps:$4 sm:$0xff]   ;;  %v4079_v28 = vld [vmem:[#allocation4 + $0x1a4] ss:$16 sps:$4 sm:$0xff]  }
 0x10c   :  { %1618 = vmatpush1.bf16.msra.mxu0 %v3980_v29  ;;  %1790 = vmatpush1.bf16.msra.mxu1 %v3983_v30  ;;  %v4082_v29 = vld [vmem:[#allocation4 + $0x1ac] ss:$16 sps:$4 sm:$0xff]   ;;  %v4077_v30 = vld [vmem:[#allocation4 + $0x1a0] ss:$16 sps:$4 sm:$0xff]  }
 0x10d   :  { %1619 = vmatprep.subr.bf16.mxu0 %v3988_v31  ;;  %1791 = vmatprep.subr.bf16.mxu1 %v3991_v32  ;;  %v4080_v31 = vld [vmem:[#allocation4 + $0x1a8] ss:$16 sps:$4 sm:$0xff]   ;;  %v4085_v32 = vld [vmem:[#allocation4 + $0x1c4] ss:$16 sps:$4 sm:$0xff]  }
 0x110   :  { %1620 = vmatpush1.bf16.msra.mxu0 %v3986_v33  ;;  %1792 = vmatpush1.bf16.msra.mxu1 %v3989_v34  ;;  %v4088_v33 = vld [vmem:[#allocation4 + $0x1cc] ss:$16 sps:$4 sm:$0xff]   ;;  %v4083_v34 = vld [vmem:[#allocation4 + $0x1c0] ss:$16 sps:$4 sm:$0xff]  }
 0x111   :  { %1621 = vmatprep.subr.bf16.mxu0 %v3994_v35  ;;  %1793 = vmatprep.subr.bf16.mxu1 %v3997_v36  ;;  %v4086_v35 = vld [vmem:[#allocation4 + $0x1c8] ss:$16 sps:$4 sm:$0xff]   ;;  %v4091_v36 = vld [vmem:[#allocation4 + $0x1e4] ss:$16 sps:$4 sm:$0xff]  }
 0x114   :  { %1622 = vmatpush1.bf16.msra.mxu0 %v3992_v37  ;;  %1794 = vmatpush1.bf16.msra.mxu1 %v3995_v38  ;;  %v4094_v37 = vld [vmem:[#allocation4 + $0x1ec] ss:$16 sps:$4 sm:$0xff]   ;;  %v4089_v38 = vld [vmem:[#allocation4 + $0x1e0] ss:$16 sps:$4 sm:$0xff]  }
 0x115   :  { %2624 = vmatprep.subr.bf16.mxu0 %v4001_v39  ;;  %2710 = vmatprep.subr.bf16.mxu1 %v4004_v40  ;;  %v4092_v39 = vld [vmem:[#allocation4 + $0x1e8] ss:$16 sps:$4 sm:$0xff]   ;;  %v4097_v40 = vld [vmem:[#allocation4 + $0x204] ss:$16 sps:$4 sm:$0xff]  }
 0x117   :  { %1640 = vmatmul.mubr.bf16.vlgmr.msra.gmra.mrb[0].mxu0 %v3998_v41  ;;  %1812 = vmatmul.mubr.bf16.vlgmr.msra.gmra.mrb[0].mxu1 %v3998_v41  ;;  %v4100_v41 = vld [vmem:[#allocation4 + $0x20c] ss:$16 sps:$4 sm:$0xff]  }
 0x118   :  { %2625 = vmatpush1.bf16.msra.mxu0 %v3999_v42  ;;  %2711 = vmatpush1.bf16.msra.mxu1 %v4002_v43  ;;  %v302_v42 = vlaneseq }
 0x119   :  { %2626 = vmatprep.subr.bf16.mxu0 %v4007_v44  ;;  %2712 = vmatprep.subr.bf16.mxu1 %v4010_v45 }
 0x11a   :  { %v4405_v43 = vshrl.u32 %v302_v42, 7  ;;  %v4134_v42 = vld [vmem:[#allocation4 + $0x2c8] ss:$16 sps:$4 sm:$0xff]  }
 0x11c   :  { %2627 = vmatpush1.bf16.msra.mxu0 %v4005_v46  ;;  %2713 = vmatpush1.bf16.msra.mxu1 %v4008_v47  ;;  %v304_v44 = vsub.s32 0, %v4405_v43  ;;  %v312_v45 = vsub.s32 2, %v4405_v43  ;;  %v300_v46 = vld [vmem:[%s4448_s2] sm:$0xf]  ;;  %v308_v47 = vsub.s32 1, %v4405_v43 }
 0x11d   :  { %2628 = vmatprep.subr.bf16.mxu0 %v4013_v48  ;;  %2714 = vmatprep.subr.bf16.mxu1 %v4016_v49  ;;  %v316_v48 = vsub.s32 3, %v4405_v43 }
 0x11e   :  { %v305_v49 = vrot.slane %v300_v46, %v304_v44 }
 0x120   :  { %2629 = vmatpush1.bf16.msra.mxu0 %v4011_v50  ;;  %2715 = vmatpush1.bf16.msra.mxu1 %v4014_v51  ;;  %v313_v50 = vrot.slane %v300_v46, %v312_v45  ;;  %v309_v51 = vrot.slane %v300_v46, %v308_v47 }
 0x121   :  { %2630 = vmatprep.subr.bf16.mxu0 %v4019_v52  ;;  %2716 = vmatprep.subr.bf16.mxu1 %v4022_v53  ;;  %v317_v52 = vrot.slane %v300_v46, %v316_v48  ;;  %v4139_v46 = vld [vmem:[#allocation4 + $0x2e4] ss:$16 sps:$4 sm:$0xff]  }
 0x124   :  { %2631 = vmatpush1.bf16.msra.mxu0 %v4017_v54  ;;  %2717 = vmatpush1.bf16.msra.mxu1 %v4020_v55 }
 0x125   :  { %2632 = vmatprep.subr.bf16.mxu0 %v4025_v56  ;;  %2718 = vmatprep.subr.bf16.mxu1 %v4028_v57 }
 0x128   :  { %2633 = vmatpush1.bf16.msra.mxu0 %v4023_v58  ;;  %2719 = vmatpush1.bf16.msra.mxu1 %v4026_v59 }
 0x129   :  { %2634 = vmatprep.subr.bf16.mxu0 %v4031_v60  ;;  %2720 = vmatprep.subr.bf16.mxu1 %v4034_v61 }
 0x12c   :  { %2635 = vmatpush1.bf16.msra.mxu0 %v4029_v62  ;;  %2721 = vmatpush1.bf16.msra.mxu1 %v4032_v63 }
 0x12d   :  { %2636 = vmatprep.subr.bf16.mxu0 %v4037_v0  ;;  %2722 = vmatprep.subr.bf16.mxu1 %v4040_v1 }
 0x130   :  { %2637 = vmatpush1.bf16.msra.mxu0 %v4035_v2  ;;  %2723 = vmatpush1.bf16.msra.mxu1 %v4038_v3 }
 0x131   :  { %2638 = vmatprep.subr.bf16.mxu0 %v4043_v4  ;;  %2724 = vmatprep.subr.bf16.mxu1 %v4046_v5 }
 0x134   :  { %2639 = vmatpush1.bf16.msra.mxu0 %v4041_v6  ;;  %2725 = vmatpush1.bf16.msra.mxu1 %v4044_v7 }
 0x135   :  { %2640 = vmatprep.subr.bf16.mxu0 %v4049_v8  ;;  %2726 = vmatprep.subr.bf16.mxu1 %v4052_v9 }
 0x138   :  { %2641 = vmatpush1.bf16.msra.mxu0 %v4047_v10  ;;  %2727 = vmatpush1.bf16.msra.mxu1 %v4050_v11 }
 0x139   :  { %2642 = vmatprep.subr.bf16.mxu0 %v4055_v12  ;;  %2728 = vmatprep.subr.bf16.mxu1 %v4058_v13 }
 0x13c   :  { %2643 = vmatpush1.bf16.msra.mxu0 %v4053_v14  ;;  %2729 = vmatpush1.bf16.msra.mxu1 %v4056_v15 }
 0x13d   :  { %2644 = vmatprep.subr.bf16.mxu0 %v4061_v16  ;;  %2730 = vmatprep.subr.bf16.mxu1 %v4064_v17  ;;  %v4095_v17 = vld [vmem:[#allocation4 + $0x200] ss:$16 sps:$4 sm:$0xff]  }
 0x140   :  { %2645 = vmatpush1.bf16.msra.mxu0 %v4059_v18  ;;  %2731 = vmatpush1.bf16.msra.mxu1 %v4062_v19  ;;  %v4098_v18 = vld [vmem:[#allocation4 + $0x208] ss:$16 sps:$4 sm:$0xff]   ;;  %v4103_v19 = vld [vmem:[#allocation4 + $0x224] ss:$16 sps:$4 sm:$0xff]  }
 0x141   :  { %2646 = vmatprep.subr.bf16.mxu0 %v4067_v20  ;;  %2732 = vmatprep.subr.bf16.mxu1 %v4070_v21  ;;  %v4106_v20 = vld [vmem:[#allocation4 + $0x22c] ss:$16 sps:$4 sm:$0xff]   ;;  %v4101_v21 = vld [vmem:[#allocation4 + $0x220] ss:$16 sps:$4 sm:$0xff]  }
 0x144   :  { %2647 = vmatpush1.bf16.msra.mxu0 %v4065_v22  ;;  %2733 = vmatpush1.bf16.msra.mxu1 %v4068_v23  ;;  %v4104_v22 = vld [vmem:[#allocation4 + $0x228] ss:$16 sps:$4 sm:$0xff]   ;;  %v4109_v23 = vld [vmem:[#allocation4 + $0x244] ss:$16 sps:$4 sm:$0xff]  }
 0x145   :  { %2648 = vmatprep.subr.bf16.mxu0 %v4073_v24  ;;  %2734 = vmatprep.subr.bf16.mxu1 %v4076_v25  ;;  %v4112_v24 = vld [vmem:[#allocation4 + $0x24c] ss:$16 sps:$4 sm:$0xff]   ;;  %v4107_v25 = vld [vmem:[#allocation4 + $0x240] ss:$16 sps:$4 sm:$0xff]  }
 0x148   :  { %2649 = vmatpush1.bf16.msra.mxu0 %v4071_v26  ;;  %2735 = vmatpush1.bf16.msra.mxu1 %v4074_v27  ;;  %v4110_v26 = vld [vmem:[#allocation4 + $0x248] ss:$16 sps:$4 sm:$0xff]   ;;  %v4115_v27 = vld [vmem:[#allocation4 + $0x264] ss:$16 sps:$4 sm:$0xff]  }
 0x149   :  { %2650 = vmatprep.subr.bf16.mxu0 %v4079_v28  ;;  %2736 = vmatprep.subr.bf16.mxu1 %v4082_v29  ;;  %v4118_v28 = vld [vmem:[#allocation4 + $0x26c] ss:$16 sps:$4 sm:$0xff]   ;;  %v4113_v29 = vld [vmem:[#allocation4 + $0x260] ss:$16 sps:$4 sm:$0xff]  }
 0x14c   :  { %2651 = vmatpush1.bf16.msra.mxu0 %v4077_v30  ;;  %2737 = vmatpush1.bf16.msra.mxu1 %v4080_v31  ;;  %v4116_v30 = vld [vmem:[#allocation4 + $0x268] ss:$16 sps:$4 sm:$0xff]   ;;  %v4121_v31 = vld [vmem:[#allocation4 + $0x284] ss:$16 sps:$4 sm:$0xff]  }
 0x14d   :  { %2652 = vmatprep.subr.bf16.mxu0 %v4085_v32  ;;  %2738 = vmatprep.subr.bf16.mxu1 %v4088_v33  ;;  %v4124_v32 = vld [vmem:[#allocation4 + $0x28c] ss:$16 sps:$4 sm:$0xff]   ;;  %v4119_v33 = vld [vmem:[#allocation4 + $0x280] ss:$16 sps:$4 sm:$0xff]  }
 0x150   :  { %2653 = vmatpush1.bf16.msra.mxu0 %v4083_v34  ;;  %2739 = vmatpush1.bf16.msra.mxu1 %v4086_v35  ;;  %v4122_v34 = vld [vmem:[#allocation4 + $0x288] ss:$16 sps:$4 sm:$0xff]   ;;  %v4127_v35 = vld [vmem:[#allocation4 + $0x2a4] ss:$16 sps:$4 sm:$0xff]  }
 0x151   :  { %2654 = vmatprep.subr.bf16.mxu0 %v4091_v36  ;;  %2740 = vmatprep.subr.bf16.mxu1 %v4094_v37  ;;  %v4130_v36 = vld [vmem:[#allocation4 + $0x2ac] ss:$16 sps:$4 sm:$0xff]   ;;  %v4125_v37 = vld [vmem:[#allocation4 + $0x2a0] ss:$16 sps:$4 sm:$0xff]  }
 0x154   :  { %2655 = vmatpush1.bf16.msra.mxu0 %v4089_v38  ;;  %2741 = vmatpush1.bf16.msra.mxu1 %v4092_v39  ;;  %v4128_v38 = vld [vmem:[#allocation4 + $0x2a8] ss:$16 sps:$4 sm:$0xff]   ;;  %v4133_v39 = vld [vmem:[#allocation4 + $0x2c4] ss:$16 sps:$4 sm:$0xff]  }
 0x155   :  { %2667 = vmatprep.subr.bf16.mxu0 %v4097_v40  ;;  %2753 = vmatprep.subr.bf16.mxu1 %v4100_v41  ;;  %v4136_v40 = vld [vmem:[#allocation4 + $0x2cc] ss:$16 sps:$4 sm:$0xff]   ;;  %v4131_v41 = vld [vmem:[#allocation4 + $0x2c0] ss:$16 sps:$4 sm:$0xff]  }
 0x1ea   :  { %v1641_v53 = vpop.f32.mrb[0].mxu0  ;;  %v1813_v54 = vpop.f32.mrb[0].mxu1 }
 0x1eb   :  { %v3597_v55 = vadd.f32 %v1641_v53, %v305_v49  ;;  %v3601_v56 = vadd.f32 %v1813_v54, %v313_v50  ;;  %v1643_v57 = vpop.f32.mrb[1].mxu0  ;;  %v1815_v58 = vpop.f32.mrb[1].mxu1  ;;  %v4148_v53 = vld [vmem:[#allocation4 + $0x30c] ss:$16 sps:$4 sm:$0xff]   ;;  %v4143_v54 = vld [vmem:[#allocation4 + $0x300] ss:$16 sps:$4 sm:$0xff]  }
 0x1ec   :  { %v3598_v59 = vadd.f32 %v1643_v57, %v309_v51  ;;  %v3602_v60 = vadd.f32 %v1815_v58, %v317_v52  ;;  %v1645_v61 = vpop.f32.mrb[2].mxu0  ;;  %v1817_v62 = vpop.f32.mrb[2].mxu1  ;;  %v4154_v57 = vld [vmem:[#allocation4 + $0x32c] ss:$16 sps:$4 sm:$0xff]   ;;  %v4149_v58 = vld [vmem:[#allocation4 + $0x320] ss:$16 sps:$4 sm:$0xff]  }
 0x1ed   :  { %v3599_v63 = vadd.f32 %v1645_v61, %v305_v49  ;;  %v3603_v0 = vadd.f32 %v1817_v62, %v313_v50  ;;  %v1647_v1 = vpop.f32.mrb[3].mxu0  ;;  %v1819_v2 = vpop.f32.mrb[3].mxu1  ;;  %v1822_v5 = vmax.f32 %v3597_v55, 0.0  ;;  %v1824_v6 = vmax.f32 %v3601_v56, 0.0  ;;  %v4142_v49 = vld [vmem:[#allocation4 + $0x2ec] ss:$16 sps:$4 sm:$0xff]  }
 0x1ee   :  { %v3600_v3 = vadd.f32 %v1647_v1, %v309_v51  ;;  %v3604_v4 = vadd.f32 %v1819_v2, %v317_v52  ;;  %v1823_v9 = vmax.f32 %v3598_v59, 0.0  ;;  %v1825_v10 = vmax.f32 %v3602_v60, 0.0  ;;  %v4137_v50 = vld [vmem:[#allocation4 + $0x2e0] ss:$16 sps:$4 sm:$0xff]   ;;  %v4140_v51 = vld [vmem:[#allocation4 + $0x2e8] ss:$16 sps:$4 sm:$0xff]  }
 0x1ef   :  { %v1826_v7 = vmax.f32 %v3599_v63, 0.0  ;;  %v1828_v8 = vmax.f32 %v3603_v0, 0.0  ;;  %v4145_v52 = vld [vmem:[#allocation4 + $0x304] ss:$16 sps:$4 sm:$0xff]   ;;  %v4146_v55 = vld [vmem:[#allocation4 + $0x308] ss:$16 sps:$4 sm:$0xff]  }
 0x1f0   :  { %v1827_v11 = vmax.f32 %v3600_v3, 0.0  ;;  %v1829_v12 = vmax.f32 %v3604_v4, 0.0  ;;  %v4151_v56 = vld [vmem:[#allocation4 + $0x324] ss:$16 sps:$4 sm:$0xff]   ;;  %v4152_v59 = vld [vmem:[#allocation4 + $0x328] ss:$16 sps:$4 sm:$0xff]  }
 0x1f1   :  { %v1830_v13 = vpack.c.bf16 %v1826_v7, %v1822_v5  ;;  %v4422_v14 = vpack.c.bf16 %v1828_v8, %v1824_v6  ;;  %v4157_v60 = vld [vmem:[#allocation4 + $0x344] ss:$16 sps:$4 sm:$0xff]   ;;  %v4160_v61 = vld [vmem:[#allocation4 + $0x34c] ss:$16 sps:$4 sm:$0xff]   ;;  %v4155_v62 = vld [vmem:[#allocation4 + $0x340] ss:$16 sps:$4 sm:$0xff]  }
 0x1f2   :  { %v1831_v15 = vpack.c.bf16 %v1827_v11, %v1823_v9  ;;  %v1833_v16 = vpack.c.bf16 %v1829_v12, %v1825_v10  ;;  %v4158_v63 = vld [vmem:[#allocation4 + $0x348] ss:$16 sps:$4 sm:$0xff]   ;;  %v4163_v0 = vld [vmem:[#allocation4 + $0x364] ss:$16 sps:$4 sm:$0xff]   ;;  %v4166_v1 = vld [vmem:[#allocation4 + $0x36c] ss:$16 sps:$4 sm:$0xff]  }
 0x1f3   :  { %v4161_v2 = vld [vmem:[#allocation4 + $0x360] ss:$16 sps:$4 sm:$0xff]   ;;  %v4164_v3 = vld [vmem:[#allocation4 + $0x368] ss:$16 sps:$4 sm:$0xff]   ;;  %v4169_v4 = vld [vmem:[#allocation4 + $0x384] ss:$16 sps:$4 sm:$0xff]  }
 0x1f4   :  { %2656 = vmatprep.mubr.bf16.mxu0 %v1831_v15  ;;  %2742 = vmatprep.mubr.bf16.mxu1 %v1831_v15  ;;  %v4172_v5 = vld [vmem:[#allocation4 + $0x38c] ss:$16 sps:$4 sm:$0xff]   ;;  %v4167_v6 = vld [vmem:[#allocation4 + $0x380] ss:$16 sps:$4 sm:$0xff]   ;;  %v4170_v7 = vld [vmem:[#allocation4 + $0x388] ss:$16 sps:$4 sm:$0xff]  }
 0x1f5   :  { %2657 = vmatmul.mubr.bf16.vlgmr.msra.gmra.mrb[4].mxu0 %v1830_v13  ;;  %2743 = vmatmul.mubr.bf16.vlgmr.msra.gmra.mrb[4].mxu1 %v1830_v13  ;;  %v4175_v8 = vld [vmem:[#allocation4 + $0x3a4] ss:$16 sps:$4 sm:$0xff]   ;;  %v4178_v9 = vld [vmem:[#allocation4 + $0x3ac] ss:$16 sps:$4 sm:$0xff]   ;;  %v4173_v10 = vld [vmem:[#allocation4 + $0x3a0] ss:$16 sps:$4 sm:$0xff]  }
 0x1f6   :  { %2668 = vmatpush1.bf16.msra.mxu0 %v4095_v17  ;;  %2754 = vmatpush1.bf16.msra.mxu1 %v4098_v18  ;;  %v4176_v11 = vld [vmem:[#allocation4 + $0x3a8] ss:$16 sps:$4 sm:$0xff]   ;;  %v4181_v12 = vld [vmem:[#allocation4 + $0x3c4] ss:$16 sps:$4 sm:$0xff]   ;;  %v4184_v13 = vld [vmem:[#allocation4 + $0x3cc] ss:$16 sps:$4 sm:$0xff]  }
 0x1f7   :  { %2699 = vmatprep.mubr.bf16.mxu0 %v1833_v16  ;;  %2785 = vmatprep.mubr.bf16.mxu1 %v1833_v16  ;;  %v4179_v15 = vld [vmem:[#allocation4 + $0x3c0] ss:$16 sps:$4 sm:$0xff]   ;;  %v4182_v16 = vld [vmem:[#allocation4 + $0x3c8] ss:$16 sps:$4 sm:$0xff]   ;;  %v4187_v17 = vld [vmem:[#allocation4 + $0x3e4] ss:$16 sps:$4 sm:$0xff]  }
 0x1f8   :  { %2669 = vmatprep.subr.bf16.mxu0 %v4103_v19  ;;  %2755 = vmatprep.subr.bf16.mxu1 %v4106_v20  ;;  %v4190_v18 = vld [vmem:[#allocation4 + $0x3ec] ss:$16 sps:$4 sm:$0xff]   ;;  %v4185_v19 = vld [vmem:[#allocation4 + $0x3e0] ss:$16 sps:$4 sm:$0xff]   ;;  %v4188_v20 = vld [vmem:[#allocation4 + $0x3e8] ss:$16 sps:$4 sm:$0xff]  }
 0x1fa   :  { %2670 = vmatpush1.bf16.msra.mxu0 %v4101_v21  ;;  %2756 = vmatpush1.bf16.msra.mxu1 %v4104_v22  ;;  %v4191_v21 = vld [vmem:[#allocation6 + $0x40] sm:$0xff]  }
 0x1fb   :  { %2671 = vmatprep.subr.bf16.mxu0 %v4109_v23  ;;  %2757 = vmatprep.subr.bf16.mxu1 %v4112_v24  ;;  %v4192_v22 = vld [vmem:[#allocation6 + $0xc0] sm:$0xff]  }
 0x1fc   :  { %v4193_v23 = vld [vmem:[#allocation6] sm:$0xff]  }
 0x1fd   :  { %v4194_v24 = vld [vmem:[#allocation6 + $0x80] sm:$0xff]  }
 0x1fe   :  { %2672 = vmatpush1.bf16.msra.mxu0 %v4107_v25  ;;  %2758 = vmatpush1.bf16.msra.mxu1 %v4110_v26  ;;  %v4195_v25 = vld [vmem:[#allocation6 + $0x48] sm:$0xff]  }
 0x1ff   :  { %2673 = vmatprep.subr.bf16.mxu0 %v4115_v27  ;;  %2759 = vmatprep.subr.bf16.mxu1 %v4118_v28  ;;  %v4196_v26 = vld [vmem:[#allocation6 + $0xc8] sm:$0xff]  }
 0x200   :  { %v4197_v27 = vld [vmem:[#allocation6 + $0x8] sm:$0xff]  }
 0x201   :  { %v4198_v28 = vld [vmem:[#allocation6 + $0x88] sm:$0xff]  }
 0x202   :  { %2674 = vmatpush1.bf16.msra.mxu0 %v4113_v29  ;;  %2760 = vmatpush1.bf16.msra.mxu1 %v4116_v30  ;;  %v4199_v29 = vld [vmem:[#allocation6 + $0x50] sm:$0xff]  }
 0x203   :  { %2675 = vmatprep.subr.bf16.mxu0 %v4121_v31  ;;  %2761 = vmatprep.subr.bf16.mxu1 %v4124_v32  ;;  %v4200_v30 = vld [vmem:[#allocation6 + $0xd0] sm:$0xff]  }
 0x204   :  { %v4201_v31 = vld [vmem:[#allocation6 + $0x10] sm:$0xff]  }
 0x205   :  { %v4202_v32 = vld [vmem:[#allocation6 + $0x90] sm:$0xff]  }
 0x206   :  { %2676 = vmatpush1.bf16.msra.mxu0 %v4119_v33  ;;  %2762 = vmatpush1.bf16.msra.mxu1 %v4122_v34  ;;  %v4203_v33 = vld [vmem:[#allocation6 + $0x58] sm:$0xff]  }
 0x207   :  { %2677 = vmatprep.subr.bf16.mxu0 %v4127_v35  ;;  %2763 = vmatprep.subr.bf16.mxu1 %v4130_v36  ;;  %v4204_v34 = vld [vmem:[#allocation6 + $0xd8] sm:$0xff]   ;;  %v4207_v36 = vld [vmem:[#allocation6 + $0x60] sm:$0xff]  }
 0x208   :  { %v4205_v35 = vld [vmem:[#allocation6 + $0x18] sm:$0xff]  }
 0x20a   :  { %2678 = vmatpush1.bf16.msra.mxu0 %v4125_v37  ;;  %2764 = vmatpush1.bf16.msra.mxu1 %v4128_v38  ;;  %v4208_v37 = vld [vmem:[#allocation6 + $0xe0] sm:$0xff]  }
 0x20b   :  { %2679 = vmatprep.subr.bf16.mxu0 %v4133_v39  ;;  %2765 = vmatprep.subr.bf16.mxu1 %v4136_v40  ;;  %v4209_v38 = vld [vmem:[#allocation6 + $0x20] sm:$0xff]   ;;  %v4211_v40 = vld [vmem:[#allocation6 + $0x68] sm:$0xff]  }
 0x20c   :  { %v4210_v39 = vld [vmem:[#allocation6 + $0xa0] sm:$0xff]  }
 0x20e   :  { %2680 = vmatpush1.bf16.msra.mxu0 %v4131_v41  ;;  %2766 = vmatpush1.bf16.msra.mxu1 %v4134_v42  ;;  %v4212_v41 = vld [vmem:[#allocation6 + $0xe8] sm:$0xff]  }
 0x20f   :  { %2681 = vmatprep.subr.bf16.mxu0 %v4139_v46  ;;  %2767 = vmatprep.subr.bf16.mxu1 %v4142_v49  ;;  %v4213_v42 = vld [vmem:[#allocation6 + $0x28] sm:$0xff]   ;;  %v4215_v49 = vld [vmem:[#allocation6 + $0x70] sm:$0xff]  }
 0x210   :  { %v4214_v46 = vld [vmem:[#allocation6 + $0xa8] sm:$0xff]  }
 0x212   :  { %2682 = vmatpush1.bf16.msra.mxu0 %v4137_v50  ;;  %2768 = vmatpush1.bf16.msra.mxu1 %v4140_v51  ;;  %v4216_v50 = vld [vmem:[#allocation6 + $0xf0] sm:$0xff]  }
 0x213   :  { %2683 = vmatprep.subr.bf16.mxu0 %v4145_v52  ;;  %2769 = vmatprep.subr.bf16.mxu1 %v4148_v53  ;;  %v4217_v51 = vld [vmem:[#allocation6 + $0x30] sm:$0xff]   ;;  %v4219_v53 = vld [vmem:[#allocation6 + $0x78] sm:$0xff]  }
 0x214   :  { %v4218_v52 = vld [vmem:[#allocation6 + $0xb0] sm:$0xff]  }
 0x216   :  { %2684 = vmatpush1.bf16.msra.mxu0 %v4143_v54  ;;  %2770 = vmatpush1.bf16.msra.mxu1 %v4146_v55  ;;  %v4220_v54 = vld [vmem:[#allocation6 + $0xf8] sm:$0xff]  }
 0x217   :  { %2685 = vmatprep.subr.bf16.mxu0 %v4151_v56  ;;  %2771 = vmatprep.subr.bf16.mxu1 %v4154_v57  ;;  %v4221_v55 = vld [vmem:[#allocation6 + $0x38] sm:$0xff]   ;;  %v1962_v57 = vld [vmem:[%s4450_s4] sm:$0xf] }
 0x218   :  { %v4222_v56 = vld [vmem:[#allocation6 + $0xb8] sm:$0xff]  }
 0x21a   :  { %2686 = vmatpush1.bf16.msra.mxu0 %v4149_v58  ;;  %2772 = vmatpush1.bf16.msra.mxu1 %v4152_v59  ;;  %v1967_v58 = vrot.slane %v1962_v57, %v304_v44  ;;  %v1975_v59 = vrot.slane %v1962_v57, %v312_v45 }
 0x21b   :  { %2687 = vmatprep.subr.bf16.mxu0 %v4157_v60  ;;  %2773 = vmatprep.subr.bf16.mxu1 %v4160_v61  ;;  %v1971_v60 = vrot.slane %v1962_v57, %v308_v47  ;;  %v1979_v61 = vrot.slane %v1962_v57, %v316_v48 }
 0x21e   :  { %2688 = vmatpush1.bf16.msra.mxu0 %v4155_v62  ;;  %2774 = vmatpush1.bf16.msra.mxu1 %v4158_v63 }
 0x21f   :  { %2689 = vmatprep.subr.bf16.mxu0 %v4163_v0  ;;  %2775 = vmatprep.subr.bf16.mxu1 %v4166_v1 }
 0x222   :  { %2690 = vmatpush1.bf16.msra.mxu0 %v4161_v2  ;;  %2776 = vmatpush1.bf16.msra.mxu1 %v4164_v3 }
 0x223   :  { %2691 = vmatprep.subr.bf16.mxu0 %v4169_v4  ;;  %2777 = vmatprep.subr.bf16.mxu1 %v4172_v5 }
 0x226   :  { %2692 = vmatpush1.bf16.msra.mxu0 %v4167_v6  ;;  %2778 = vmatpush1.bf16.msra.mxu1 %v4170_v7 }
 0x227   :  { %2693 = vmatprep.subr.bf16.mxu0 %v4175_v8  ;;  %2779 = vmatprep.subr.bf16.mxu1 %v4178_v9 }
 0x22a   :  { %2694 = vmatpush1.bf16.msra.mxu0 %v4173_v10  ;;  %2780 = vmatpush1.bf16.msra.mxu1 %v4176_v11 }
 0x22b   :  { %2695 = vmatprep.subr.bf16.mxu0 %v4181_v12  ;;  %2781 = vmatprep.subr.bf16.mxu1 %v4184_v13 }
 0x22e   :  { %2696 = vmatpush1.bf16.msra.mxu0 %v4179_v15  ;;  %2782 = vmatpush1.bf16.msra.mxu1 %v4182_v16 }
 0x22f   :  { %2697 = vmatprep.subr.bf16.mxu0 %v4187_v17  ;;  %2783 = vmatprep.subr.bf16.mxu1 %v4190_v18 }
 0x232   :  { %2698 = vmatpush1.bf16.msra.mxu0 %v4185_v19  ;;  %2784 = vmatpush1.bf16.msra.mxu1 %v4188_v20 }
 0x233   :  { %3553 = vmatprep.subr.bf16.mxu0 %v4191_v21  ;;  %3575 = vmatprep.subr.bf16.mxu1 %v4192_v22 }
 0x235   :  { %2700 = vmatmul.mubr.bf16.vlgmr.msra.gmra.mrb[4].mxu0 %v4422_v14  ;;  %2786 = vmatmul.mubr.bf16.vlgmr.msra.gmra.mrb[4].mxu1 %v4422_v14  ;;  %v4206_v14 = vld [vmem:[#allocation6 + $0x98] sm:$0xff]  }
 0x236   :  { %3554 = vmatpush3.bf16.msra.mxu0 %v4193_v23  ;;  %3576 = vmatpush3.bf16.msra.mxu1 %v4194_v24  ;;  %v3520_v24 = vld [vmem:[%s4452_s6] ss:$0 sm:$0xff] }
 0x237   :  { %3555 = vmatprep.subr.bf16.mxu0 %v4195_v25  ;;  %3577 = vmatprep.subr.bf16.mxu1 %v4196_v26 }
 0x23a   :  { %3556 = vmatpush3.bf16.msra.mxu0 %v4197_v27  ;;  %3578 = vmatpush3.bf16.msra.mxu1 %v4198_v28 }
 0x23b   :  { %3557 = vmatprep.subr.bf16.mxu0 %v4199_v29  ;;  %3579 = vmatprep.subr.bf16.mxu1 %v4200_v30 }
 0x23e   :  { %3558 = vmatpush3.bf16.msra.mxu0 %v4201_v31  ;;  %3580 = vmatpush3.bf16.msra.mxu1 %v4202_v32 }
 0x23f   :  { %3559 = vmatprep.subr.bf16.mxu0 %v4203_v33  ;;  %3581 = vmatprep.subr.bf16.mxu1 %v4204_v34 }
 0x242   :  { %3560 = vmatpush3.bf16.msra.mxu0 %v4205_v35  ;;  %3582 = vmatpush3.bf16.msra.mxu1 %v4206_v14 }
 0x243   :  { %3561 = vmatprep.subr.bf16.mxu0 %v4207_v36  ;;  %3583 = vmatprep.subr.bf16.mxu1 %v4208_v37 }
 0x246   :  { %3562 = vmatpush3.bf16.msra.mxu0 %v4209_v38  ;;  %3584 = vmatpush3.bf16.msra.mxu1 %v4210_v39 }
 0x247   :  { %3563 = vmatprep.subr.bf16.mxu0 %v4211_v40  ;;  %3585 = vmatprep.subr.bf16.mxu1 %v4212_v41 }
 0x24a   :  { %3564 = vmatpush3.bf16.msra.mxu0 %v4213_v42  ;;  %3586 = vmatpush3.bf16.msra.mxu1 %v4214_v46 }
 0x24b   :  { %3565 = vmatprep.subr.bf16.mxu0 %v4215_v49  ;;  %3587 = vmatprep.subr.bf16.mxu1 %v4216_v50 }
 0x24e   :  { %3566 = vmatpush3.bf16.msra.mxu0 %v4217_v51  ;;  %3588 = vmatpush3.bf16.msra.mxu1 %v4218_v52 }
 0x24f   :  { %3567 = vmatprep.subr.bf16.mxu0 %v4219_v53  ;;  %3589 = vmatprep.subr.bf16.mxu1 %v4220_v54 }
 0x252   :  { %3568 = vmatpush3.bf16.msra.mxu0 %v4221_v55  ;;  %3590 = vmatpush3.bf16.msra.mxu1 %v4222_v56 }
 0x308   :  { %v2701_v62 = vpop.f32.mrb[4].mxu0  ;;  %v2787_v63 = vpop.f32.mrb[4].mxu1 }
 0x309   :  { %v3605_v0 = vadd.f32 %v2701_v62, %v1967_v58  ;;  %v3609_v1 = vadd.f32 %v2787_v63, %v1975_v59  ;;  %v2703_v2 = vpop.f32.mrb[5].mxu0  ;;  %v2789_v3 = vpop.f32.mrb[5].mxu1 }
 0x30a   :  { %v3606_v4 = vadd.f32 %v2703_v2, %v1971_v60  ;;  %v3610_v5 = vadd.f32 %v2789_v3, %v1979_v61  ;;  %v2705_v6 = vpop.f32.mrb[6].mxu0  ;;  %v2791_v7 = vpop.f32.mrb[6].mxu1 }
 0x30b   :  { %v3607_v44 = vadd.f32 %v2705_v6, %v1967_v58  ;;  %v3611_v8 = vadd.f32 %v2791_v7, %v1975_v59  ;;  %v2707_v9 = vpop.f32.mrb[7].mxu0  ;;  %v2793_v45 = vpop.f32.mrb[7].mxu1  ;;  %v2796_v47 = vmax.f32 %v3605_v0, 0.0  ;;  %v2798_v12 = vmax.f32 %v3609_v1, 0.0 }
 0x30c   :  { %v3608_v10 = vadd.f32 %v2707_v9, %v1971_v60  ;;  %v3612_v11 = vadd.f32 %v2793_v45, %v1979_v61  ;;  %v2797_v13 = vmax.f32 %v3606_v4, 0.0  ;;  %v2799_v15 = vmax.f32 %v3610_v5, 0.0 }
 0x30d   :  { %v2800_v43 = vmax.f32 %v3607_v44, 0.0  ;;  %v2802_v48 = vmax.f32 %v3611_v8, 0.0 }
 0x30e   :  { %v2801_v16 = vmax.f32 %v3608_v10, 0.0  ;;  %v2803_v17 = vmax.f32 %v3612_v11, 0.0 }
 0x30f   :  { %v2804_v18 = vpack.c.bf16 %v2800_v43, %v2796_v47  ;;  %v2806_v19 = vpack.c.bf16 %v2802_v48, %v2798_v12 }
 0x310   :  { %v2805_v20 = vpack.c.bf16 %v2801_v16, %v2797_v13  ;;  %v2807_v21 = vpack.c.bf16 %v2803_v17, %v2799_v15 }
 0x312   :  { %3103 = vmatprep.mubr.bf16.mxu0 %v2805_v20  ;;  %3144 = vmatprep.mubr.bf16.mxu1 %v2807_v21 }
 0x313   :  { %3104 = vmatmul.mubr.bf16.vlgmr.msra.gmra.mrb[8].mxu0 %v2804_v18  ;;  %3145 = vmatmul.mubr.bf16.vlgmr.msra.gmra.mrb[8].mxu1 %v2806_v19 }
 0x3e6   :  { %v3569_v22 = vpop.f32.mrb[8].mxu0  ;;  %v3591_v23 = vpop.f32.mrb[8].mxu1 }
 0x3e7   :  { %v3570_v25 = vpop.f32.mrb[9].mxu0  ;;  %v3592_v26 = vpop.f32.mrb[9].mxu1 }
 0x3e8   :  { %v3571_v27 = vadd.f32 %v3570_v25, %v3569_v22  ;;  %v3593_v28 = vadd.f32 %v3592_v26, %v3591_v23  ;;  %v3572_v29 = vpop.f32.mrb[10].mxu0  ;;  %v3594_v30 = vpop.f32.mrb[10].mxu1 }
 0x3e9   :  { %v3573_v31 = vpop.f32.mrb[11].mxu0  ;;  %v3595_v32 = vpop.f32.mrb[11].mxu1 }
 0x3ea   :  { %v3106_v33 = vadd.f32 %v3571_v27, %v3520_v24  ;;  %v3574_v34 = vadd.f32 %v3573_v31, %v3572_v29  ;;  %v3596_v35 = vadd.f32 %v3595_v32, %v3594_v30 }
 0x3ec   :  { %v3147_v14 = vadd.f32 %v3593_v28, %v3106_v33  ;;  %v3109_v36 = vadd.f32 %v3574_v34, %v3520_v24 }
 0x3ee   :  { %3153 = vst [vmem:[%s4453_s7] sm:$0xff] %v3147_v14  ;;  %v3150_v37 = vadd.f32 %v3596_v35, %v3109_v36 }
 0x3f0   :  { %3154 = vst [vmem:[%s4453_s7 + $0x8] sm:$0xff] %v3150_v37 }
 0x3f1   :  { %3159 = vsyncpa [#allocation3], 1 }
 0x3f2   :  { %3160 = vsyncpa [#allocation5], 1 }

</bundles_post_ra>
